<compile_context>
chip_gen: v7x
topology: tpu7x:2x2x1
jax: 0.10.0
libtpu: 0.0.40
codegen_flags: <defaults>
</compile_context>

<pallas_src>
import jax
import jax.numpy as jnp
from jax.experimental import pallas as pl
from jax.experimental.pallas import tpu as pltpu


def _conv3x3_relu_kernel(x_ref, w_ref, b_ref, o_ref, xpad_ref):
    """o = relu(conv3x3(x, padding=1) + b) for a block of B_blk images.

    x_ref:    (B_blk, C_in, H, W)     unpadded input block (VMEM)
    w_ref:    (C_out*C_in*9,)         conv weights, flat OIHW order (SMEM scalars)
    b_ref:    (C_out,)                bias (SMEM scalars)
    o_ref:    (B_blk, C_out, H, W)    output block (VMEM)
    xpad_ref: (C_in, H+2, W+2)        f32 padded-plane scratch, reused per image
    """
    b_blk, c_in, H, W = x_ref.shape
    c_out = o_ref.shape[1]

    # Zero the padded scratch once per grid step.  The halo border is never
    # written afterwards (only the interior is overwritten per image), so it
    # stays zero for every image in the block.  Doing this per-step -- not only
    # at program_id==0 -- keeps it correct when the "parallel" batch axis is
    # sharded across v7x's two TensorCores (each core owns its own scratch).
    xpad_ref[...] = jnp.zeros_like(xpad_ref)

    for b in range(b_blk):  # statically unrolled batch block
        # In-kernel padding=1: copy this image into the scratch interior.
        # f32 scratch keeps the VPU math f32 (v5e has no bf16 VALU).
        for ci in range(c_in):
            xpad_ref[ci, 1:1 + H, 1:1 + W] = x_ref[b, ci].astype(jnp.float32)

        # Bias folded into the accumulator init (broadcast of an SMEM scalar).
        accs = [jnp.full((H, W), b_ref[co], dtype=jnp.float32)
                for co in range(c_out)]

        # Tap-outer / c_out-inner: each (ci, dh) row band is loaded from the ref
        # once, each lane-shifted tap slice is computed once and reused for all
        # C_out accumulators.  vld has spare slots under the VALU FMA cadence,
        # so re-loading bands is free while vreg pressure stays tiny.
        for ci in range(c_in):
            for dh in range(3):
                band = xpad_ref[ci, dh:dh + H, :]            # (H, W+2) f32
                for dw in range(3):
                    tap = band[:, dw:dw + W]                 # hoisted per tap
                    for co in range(c_out):
                        w = w_ref[((co * c_in + ci) * 3 + dh) * 3 + dw]
                        accs[co] = accs[co] + tap * w

        # Fused ReLU + downcast in the store epilogue.
        for co in range(c_out):
            o_ref[b, co] = jnp.maximum(accs[co], 0.0).astype(o_ref.dtype)


def _pick_batch_block(n, per_image_bytes, scratch_bytes, budget_bytes,
                      max_unroll=8):
    """Largest divisor of n that (a) keeps >=2 grid steps when n >= 2 so both
    v7x TensorCores get work, (b) fits the double-buffered VMEM budget, and
    (c) caps the static in-kernel unroll."""
    best = 1
    for cand in range(1, min(n, max_unroll) + 1):
        if n % cand:
            continue
        if n >= 2 and n // cand < 2:
            continue
        if 2 * cand * per_image_bytes + scratch_bytes > budget_bytes:
            continue
        best = cand
    return best


@jax.jit
def single_conv_forward(x_nchw, weight, bias):
    """Forward pass of single_conv (3x3 conv, padding=1, bias, ReLU).

    x_nchw: (N, C_in, H, W)
    weight: (C_out, C_in, 3, 3)   PyTorch Conv2d layout
    bias:   (C_out,)
    returns (N, C_out, H, W)
    """
    N, C_in, H, W = x_nchw.shape
    C_out = weight.shape[0]
    assert weight.shape == (C_out, C_in, 3, 3), weight.shape

    w_flat = weight.reshape(-1).astype(jnp.float32)   # flat OIHW -> SMEM scalars
    b_vec = bias.astype(jnp.float32)

    # Per-grid-step working set: double-buffered (input + output) image blocks
    # plus the single padded-plane scratch.  Budgeted for v7x (64 MiB / TC).
    dsize = jnp.dtype(x_nchw.dtype).itemsize
    per_image_bytes = (C_in + C_out) * H * W * dsize
    scratch_bytes = C_in * (H + 2) * (W + 2) * 4
    budget_bytes = 24 * 2**20
    B_blk = _pick_batch_block(N, per_image_bytes, scratch_bytes, budget_bytes)
    grid = (N // B_blk,)

    vmem_limit = int(min(
        32 * 2**20,
        max(16 * 2**20,
            2 * B_blk * per_image_bytes + scratch_bytes + 4 * 2**20)))

    return pl.pallas_call(
        _conv3x3_relu_kernel,
        out_shape=jax.ShapeDtypeStruct((N, C_out, H, W), x_nchw.dtype),
        grid_spec=pltpu.PrefetchScalarGridSpec(
            num_scalar_prefetch=0,
            grid=grid,
            in_specs=[
                # B_blk unpadded images per grid step.
                pl.BlockSpec((B_blk, C_in, H, W), lambda n: (n, 0, 0, 0)),
                # Weights / bias: tiny, scalar-read -> SMEM, resident across grid.
                pl.BlockSpec(memory_space=pltpu.MemorySpace.SMEM),
                pl.BlockSpec(memory_space=pltpu.MemorySpace.SMEM),
            ],
            out_specs=pl.BlockSpec((B_blk, C_out, H, W), lambda n: (n, 0, 0, 0)),
            scratch_shapes=[pltpu.VMEM((C_in, H + 2, W + 2), jnp.float32)],
        ),
        compiler_params=pltpu.CompilerParams(
            dimension_semantics=("parallel",),   # batch blocks shard across v7x TCs
            vmem_limit_bytes=vmem_limit,
        ),
    )(x_nchw, w_flat, b_vec)


if __name__ == "__main__":
    key = jax.random.PRNGKey(0)
    k_x, k_w, k_b = jax.random.split(key, 3)

    N, C_in, C_out, H, W = 2, 4, 3, 16, 16

    x = jax.random.normal(k_x, (N, C_in, H, W), dtype=jnp.float32)
    weight = jax.random.normal(k_w, (C_out, C_in, 3, 3), dtype=jnp.float32) * 0.1
    bias = jax.random.normal(k_b, (C_out,), dtype=jnp.float32) * 0.1

    y = single_conv_forward(x, weight, bias)
    y = jax.block_until_ready(y)

    # Pure-JAX reference: 3x3 conv (padding=1) + bias, then ReLU.
    y_conv = jax.lax.conv_general_dilated(
        x, weight, window_strides=(1, 1), padding=((1, 1), (1, 1)),
        dimension_numbers=("NCHW", "OIHW", "NCHW"))
    y_ref = jnp.maximum(y_conv + bias[None, :, None, None], 0.0)

    assert y.shape == (N, C_out, H, W), y.shape
    assert jnp.allclose(y, y_ref, atol=1e-5, rtol=1e-5), \
        float(jnp.max(jnp.abs(y - y_ref)))

    print("KERNEL_OK")
</pallas_src>

<mosaic_0001>
module attributes {stable_mosaic.version = 11 : i64} {
  func.func @_conv3x3_relu_kernel(%arg0: i32, %arg1: memref<1x4x16x16xf32, #tpu.memory_space<vmem>>, %arg2: memref<108xf32, #tpu.memory_space<smem>>, %arg3: memref<3xf32, #tpu.memory_space<smem>>, %arg4: memref<1x3x16x16xf32, #tpu.memory_space<vmem>>, %arg5: memref<4x18x18xf32, #tpu.memory_space<vmem>>) attributes {dimension_semantics = [#tpu.dimension_semantics<parallel>], iteration_bounds = array<i64: 2>, scalar_prefetch = 0 : i64, scratch_operands = 1 : i64, tpu.core_type = #tpu.core_type<tc>, window_params = [{transform_indices = @transform_0, window_bounds = array<i64: 1, 4, 16, 16>}, {transform_indices = @transform_1, window_bounds = array<i64: 108>}, {transform_indices = @transform_2, window_bounds = array<i64: 3>}, {transform_indices = @transform_3, window_bounds = array<i64: 1, 3, 16, 16>}]} {
    %cst = arith.constant 0.000000e+00 : f32
    %0 = vector.broadcast %cst : f32 to vector<4x18x18xf32>
    %c0 = arith.constant 0 : index
    %c0_0 = arith.constant 0 : index
    %c0_1 = arith.constant 0 : index
    %1 = vector.load %arg5[%c0, %c0_0, %c0_1] : memref<4x18x18xf32, #tpu.memory_space<vmem>>, vector<4x18x18xf32>
    tpu.vector_store %arg5[%c0, %c0_0, %c0_1], %0 {strides = array<i32>} : memref<4x18x18xf32, #tpu.memory_space<vmem>>, vector<4x18x18xf32>,
    %c0_2 = arith.constant 0 : index
    %c0_3 = arith.constant 0 : index
    %c0_4 = arith.constant 0 : index
    %c0_5 = arith.constant 0 : index
    %2 = vector.load %arg1[%c0_2, %c0_3, %c0_4, %c0_5] : memref<1x4x16x16xf32, #tpu.memory_space<vmem>>, vector<1x1x16x16xf32>
    %3 = vector.shape_cast %2 : vector<1x1x16x16xf32> to vector<16x16xf32>
    %c0_6 = arith.constant 0 : index
    %c1 = arith.constant 1 : index
    %c1_7 = arith.constant 1 : index
    %4 = vector.load %arg5[%c0_6, %c1, %c1_7] : memref<4x18x18xf32, #tpu.memory_space<vmem>>, vector<1x16x16xf32>
    %5 = vector.shape_cast %4 : vector<1x16x16xf32> to vector<16x16xf32>
    %6 = vector.shape_cast %3 : vector<16x16xf32> to vector<1x16x16xf32>
    tpu.vector_store %arg5[%c0_6, %c1, %c1_7], %6 {strides = array<i32>} : memref<4x18x18xf32, #tpu.memory_space<vmem>>, vector<1x16x16xf32>,
    %c0_8 = arith.constant 0 : index
    %c1_9 = arith.constant 1 : index
    %c0_10 = arith.constant 0 : index
    %c0_11 = arith.constant 0 : index
    %7 = vector.load %arg1[%c0_8, %c1_9, %c0_10, %c0_11] : memref<1x4x16x16xf32, #tpu.memory_space<vmem>>, vector<1x1x16x16xf32>
    %8 = vector.shape_cast %7 : vector<1x1x16x16xf32> to vector<16x16xf32>
    %c1_12 = arith.constant 1 : index
    %c1_13 = arith.constant 1 : index
    %c1_14 = arith.constant 1 : index
    %9 = vector.load %arg5[%c1_12, %c1_13, %c1_14] : memref<4x18x18xf32, #tpu.memory_space<vmem>>, vector<1x16x16xf32>
    %10 = vector.shape_cast %9 : vector<1x16x16xf32> to vector<16x16xf32>
    %11 = vector.shape_cast %8 : vector<16x16xf32> to vector<1x16x16xf32>
    tpu.vector_store %arg5[%c1_12, %c1_13, %c1_14], %11 {strides = array<i32>} : memref<4x18x18xf32, #tpu.memory_space<vmem>>, vector<1x16x16xf32>,
    %c0_15 = arith.constant 0 : index
    %c2 = arith.constant 2 : index
    %c0_16 = arith.constant 0 : index
    %c0_17 = arith.constant 0 : index
    %12 = vector.load %arg1[%c0_15, %c2, %c0_16, %c0_17] : memref<1x4x16x16xf32, #tpu.memory_space<vmem>>, vector<1x1x16x16xf32>
    %13 = vector.shape_cast %12 : vector<1x1x16x16xf32> to vector<16x16xf32>
    %c2_18 = arith.constant 2 : index
    %c1_19 = arith.constant 1 : index
    %c1_20 = arith.constant 1 : index
    %14 = vector.load %arg5[%c2_18, %c1_19, %c1_20] : memref<4x18x18xf32, #tpu.memory_space<vmem>>, vector<1x16x16xf32>
    %15 = vector.shape_cast %14 : vector<1x16x16xf32> to vector<16x16xf32>
    %16 = vector.shape_cast %13 : vector<16x16xf32> to vector<1x16x16xf32>
    tpu.vector_store %arg5[%c2_18, %c1_19, %c1_20], %16 {strides = array<i32>} : memref<4x18x18xf32, #tpu.memory_space<vmem>>, vector<1x16x16xf32>,
    %c0_21 = arith.constant 0 : index
    %c3 = arith.constant 3 : index
    %c0_22 = arith.constant 0 : index
    %c0_23 = arith.constant 0 : index
    %17 = vector.load %arg1[%c0_21, %c3, %c0_22, %c0_23] : memref<1x4x16x16xf32, #tpu.memory_space<vmem>>, vector<1x1x16x16xf32>
    %18 = vector.shape_cast %17 : vector<1x1x16x16xf32> to vector<16x16xf32>
    %c3_24 = arith.constant 3 : index
    %c1_25 = arith.constant 1 : index
    %c1_26 = arith.constant 1 : index
    %19 = vector.load %arg5[%c3_24, %c1_25, %c1_26] : memref<4x18x18xf32, #tpu.memory_space<vmem>>, vector<1x16x16xf32>
    %20 = vector.shape_cast %19 : vector<1x16x16xf32> to vector<16x16xf32>
    %21 = vector.shape_cast %18 : vector<16x16xf32> to vector<1x16x16xf32>
    tpu.vector_store %arg5[%c3_24, %c1_25, %c1_26], %21 {strides = array<i32>} : memref<4x18x18xf32, #tpu.memory_space<vmem>>, vector<1x16x16xf32>,
    %c0_27 = arith.constant 0 : index
    %22 = memref.load %arg3[%c0_27] : memref<3xf32, #tpu.memory_space<smem>>
    %23 = vector.broadcast %22 : f32 to vector<16x16xf32>
    %c1_28 = arith.constant 1 : index
    %24 = memref.load %arg3[%c1_28] : memref<3xf32, #tpu.memory_space<smem>>
    %25 = vector.broadcast %24 : f32 to vector<16x16xf32>
    %c2_29 = arith.constant 2 : index
    %26 = memref.load %arg3[%c2_29] : memref<3xf32, #tpu.memory_space<smem>>
    %27 = vector.broadcast %26 : f32 to vector<16x16xf32>
    %c0_30 = arith.constant 0 : index
    %c0_31 = arith.constant 0 : index
    %c0_32 = arith.constant 0 : index
    %28 = vector.load %arg5[%c0_30, %c0_31, %c0_32] : memref<4x18x18xf32, #tpu.memory_space<vmem>>, vector<1x16x18xf32>
    %29 = vector.shape_cast %28 : vector<1x16x18xf32> to vector<16x18xf32>
    %30 = vector.extract_strided_slice %29 {offsets = [0, 0], sizes = [16, 16], strides = [1, 1]} : vector<16x18xf32> to vector<16x16xf32>
    %c0_33 = arith.constant 0 : index
    %31 = memref.load %arg2[%c0_33] : memref<108xf32, #tpu.memory_space<smem>>
    %32 = vector.broadcast %31 : f32 to vector<16x16xf32>
    %33 = arith.mulf %30, %32 : vector<16x16xf32>
    %34 = arith.addf %23, %33 : vector<16x16xf32>
    %c36 = arith.constant 36 : index
    %35 = memref.load %arg2[%c36] : memref<108xf32, #tpu.memory_space<smem>>
    %36 = vector.broadcast %35 : f32 to vector<16x16xf32>
    %37 = arith.mulf %30, %36 : vector<16x16xf32>
    %38 = arith.addf %25, %37 : vector<16x16xf32>
    %c72 = arith.constant 72 : index
    %39 = memref.load %arg2[%c72] : memref<108xf32, #tpu.memory_space<smem>>
    %40 = vector.broadcast %39 : f32 to vector<16x16xf32>
    %41 = arith.mulf %30, %40 : vector<16x16xf32>
    %42 = arith.addf %27, %41 : vector<16x16xf32>
    %43 = vector.extract_strided_slice %29 {offsets = [0, 1], sizes = [16, 16], strides = [1, 1]} : vector<16x18xf32> to vector<16x16xf32>
    %c1_34 = arith.constant 1 : index
    %44 = memref.load %arg2[%c1_34] : memref<108xf32, #tpu.memory_space<smem>>
    %45 = vector.broadcast %44 : f32 to vector<16x16xf32>
    %46 = arith.mulf %43, %45 : vector<16x16xf32>
    %47 = arith.addf %34, %46 : vector<16x16xf32>
    %c37 = arith.constant 37 : index
    %48 = memref.load %arg2[%c37] : memref<108xf32, #tpu.memory_space<smem>>
    %49 = vector.broadcast %48 : f32 to vector<16x16xf32>
    %50 = arith.mulf %43, %49 : vector<16x16xf32>
    %51 = arith.addf %38, %50 : vector<16x16xf32>
    %c73 = arith.constant 73 : index
    %52 = memref.load %arg2[%c73] : memref<108xf32, #tpu.memory_space<smem>>
    %53 = vector.broadcast %52 : f32 to vector<16x16xf32>
    %54 = arith.mulf %43, %53 : vector<16x16xf32>
    %55 = arith.addf %42, %54 : vector<16x16xf32>
    %56 = vector.extract_strided_slice %29 {offsets = [0, 2], sizes = [16, 16], strides = [1, 1]} : vector<16x18xf32> to vector<16x16xf32>
    %c2_35 = arith.constant 2 : index
    %57 = memref.load %arg2[%c2_35] : memref<108xf32, #tpu.memory_space<smem>>
    %58 = vector.broadcast %57 : f32 to vector<16x16xf32>
    %59 = arith.mulf %56, %58 : vector<16x16xf32>
    %60 = arith.addf %47, %59 : vector<16x16xf32>
    %c38 = arith.constant 38 : index
    %61 = memref.load %arg2[%c38] : memref<108xf32, #tpu.memory_space<smem>>
    %62 = vector.broadcast %61 : f32 to vector<16x16xf32>
    %63 = arith.mulf %56, %62 : vector<16x16xf32>
    %64 = arith.addf %51, %63 : vector<16x16xf32>
    %c74 = arith.constant 74 : index
    %65 = memref.load %arg2[%c74] : memref<108xf32, #tpu.memory_space<smem>>
    %66 = vector.broadcast %65 : f32 to vector<16x16xf32>
    %67 = arith.mulf %56, %66 : vector<16x16xf32>
    %68 = arith.addf %55, %67 : vector<16x16xf32>
    %c0_36 = arith.constant 0 : index
    %c1_37 = arith.constant 1 : index
    %c0_38 = arith.constant 0 : index
    %69 = vector.load %arg5[%c0_36, %c1_37, %c0_38] : memref<4x18x18xf32, #tpu.memory_space<vmem>>, vector<1x16x18xf32>
    %70 = vector.shape_cast %69 : vector<1x16x18xf32> to vector<16x18xf32>
    %71 = vector.extract_strided_slice %70 {offsets = [0, 0], sizes = [16, 16], strides = [1, 1]} : vector<16x18xf32> to vector<16x16xf32>
    %c3_39 = arith.constant 3 : index
    %72 = memref.load %arg2[%c3_39] : memref<108xf32, #tpu.memory_space<smem>>
    %73 = vector.broadcast %72 : f32 to vector<16x16xf32>
    %74 = arith.mulf %71, %73 : vector<16x16xf32>
    %75 = arith.addf %60, %74 : vector<16x16xf32>
    %c39 = arith.constant 39 : index
    %76 = memref.load %arg2[%c39] : memref<108xf32, #tpu.memory_space<smem>>
    %77 = vector.broadcast %76 : f32 to vector<16x16xf32>
    %78 = arith.mulf %71, %77 : vector<16x16xf32>
    %79 = arith.addf %64, %78 : vector<16x16xf32>
    %c75 = arith.constant 75 : index
    %80 = memref.load %arg2[%c75] : memref<108xf32, #tpu.memory_space<smem>>
    %81 = vector.broadcast %80 : f32 to vector<16x16xf32>
    %82 = arith.mulf %71, %81 : vector<16x16xf32>
    %83 = arith.addf %68, %82 : vector<16x16xf32>
    %84 = vector.extract_strided_slice %70 {offsets = [0, 1], sizes = [16, 16], strides = [1, 1]} : vector<16x18xf32> to vector<16x16xf32>
    %c4 = arith.constant 4 : index
    %85 = memref.load %arg2[%c4] : memref<108xf32, #tpu.memory_space<smem>>
    %86 = vector.broadcast %85 : f32 to vector<16x16xf32>
    %87 = arith.mulf %84, %86 : vector<16x16xf32>
    %88 = arith.addf %75, %87 : vector<16x16xf32>
    %c40 = arith.constant 40 : index
    %89 = memref.load %arg2[%c40] : memref<108xf32, #tpu.memory_space<smem>>
    %90 = vector.broadcast %89 : f32 to vector<16x16xf32>
    %91 = arith.mulf %84, %90 : vector<16x16xf32>
    %92 = arith.addf %79, %91 : vector<16x16xf32>
    %c76 = arith.constant 76 : index
    %93 = memref.load %arg2[%c76] : memref<108xf32, #tpu.memory_space<smem>>
    %94 = vector.broadcast %93 : f32 to vector<16x16xf32>
    %95 = arith.mulf %84, %94 : vector<16x16xf32>
    %96 = arith.addf %83, %95 : vector<16x16xf32>
    %97 = vector.extract_strided_slice %70 {offsets = [0, 2], sizes = [16, 16], strides = [1, 1]} : vector<16x18xf32> to vector<16x16xf32>
    %c5 = arith.constant 5 : index
    %98 = memref.load %arg2[%c5] : memref<108xf32, #tpu.memory_space<smem>>
    %99 = vector.broadcast %98 : f32 to vector<16x16xf32>
    %100 = arith.mulf %97, %99 : vector<16x16xf32>
    %101 = arith.addf %88, %100 : vector<16x16xf32>
    %c41 = arith.constant 41 : index
    %102 = memref.load %arg2[%c41] : memref<108xf32, #tpu.memory_space<smem>>
    %103 = vector.broadcast %102 : f32 to vector<16x16xf32>
    %104 = arith.mulf %97, %103 : vector<16x16xf32>
    %105 = arith.addf %92, %104 : vector<16x16xf32>
    %c77 = arith.constant 77 : index
    %106 = memref.load %arg2[%c77] : memref<108xf32, #tpu.memory_space<smem>>
    %107 = vector.broadcast %106 : f32 to vector<16x16xf32>
    %108 = arith.mulf %97, %107 : vector<16x16xf32>
    %109 = arith.addf %96, %108 : vector<16x16xf32>
    %c0_40 = arith.constant 0 : index
    %c2_41 = arith.constant 2 : index
    %c0_42 = arith.constant 0 : index
    %110 = vector.load %arg5[%c0_40, %c2_41, %c0_42] : memref<4x18x18xf32, #tpu.memory_space<vmem>>, vector<1x16x18xf32>
    %111 = vector.shape_cast %110 : vector<1x16x18xf32> to vector<16x18xf32>
    %112 = vector.extract_strided_slice %111 {offsets = [0, 0], sizes = [16, 16], strides = [1, 1]} : vector<16x18xf32> to vector<16x16xf32>
    %c6 = arith.constant 6 : index
    %113 = memref.load %arg2[%c6] : memref<108xf32, #tpu.memory_space<smem>>
    %114 = vector.broadcast %113 : f32 to vector<16x16xf32>
    %115 = arith.mulf %112, %114 : vector<16x16xf32>
    %116 = arith.addf %101, %115 : vector<16x16xf32>
    %c42 = arith.constant 42 : index
    %117 = memref.load %arg2[%c42] : memref<108xf32, #tpu.memory_space<smem>>
    %118 = vector.broadcast %117 : f32 to vector<16x16xf32>
    %119 = arith.mulf %112, %118 : vector<16x16xf32>
    %120 = arith.addf %105, %119 : vector<16x16xf32>
    %c78 = arith.constant 78 : index
    %121 = memref.load %arg2[%c78] : memref<108xf32, #tpu.memory_space<smem>>
    %122 = vector.broadcast %121 : f32 to vector<16x16xf32>
    %123 = arith.mulf %112, %122 : vector<16x16xf32>
    %124 = arith.addf %109, %123 : vector<16x16xf32>
    %125 = vector.extract_strided_slice %111 {offsets = [0, 1], sizes = [16, 16], strides = [1, 1]} : vector<16x18xf32> to vector<16x16xf32>
    %c7 = arith.constant 7 : index
    %126 = memref.load %arg2[%c7] : memref<108xf32, #tpu.memory_space<smem>>
    %127 = vector.broadcast %126 : f32 to vector<16x16xf32>
    %128 = arith.mulf %125, %127 : vector<16x16xf32>
    %129 = arith.addf %116, %128 : vector<16x16xf32>
    %c43 = arith.constant 43 : index
    %130 = memref.load %arg2[%c43] : memref<108xf32, #tpu.memory_space<smem>>
    %131 = vector.broadcast %130 : f32 to vector<16x16xf32>
    %132 = arith.mulf %125, %131 : vector<16x16xf32>
    %133 = arith.addf %120, %132 : vector<16x16xf32>
    %c79 = arith.constant 79 : index
    %134 = memref.load %arg2[%c79] : memref<108xf32, #tpu.memory_space<smem>>
    %135 = vector.broadcast %134 : f32 to vector<16x16xf32>
    %136 = arith.mulf %125, %135 : vector<16x16xf32>
    %137 = arith.addf %124, %136 : vector<16x16xf32>
    %138 = vector.extract_strided_slice %111 {offsets = [0, 2], sizes = [16, 16], strides = [1, 1]} : vector<16x18xf32> to vector<16x16xf32>
    %c8 = arith.constant 8 : index
    %139 = memref.load %arg2[%c8] : memref<108xf32, #tpu.memory_space<smem>>
    %140 = vector.broadcast %139 : f32 to vector<16x16xf32>
    %141 = arith.mulf %138, %140 : vector<16x16xf32>
    %142 = arith.addf %129, %141 : vector<16x16xf32>
    %c44 = arith.constant 44 : index
    %143 = memref.load %arg2[%c44] : memref<108xf32, #tpu.memory_space<smem>>
    %144 = vector.broadcast %143 : f32 to vector<16x16xf32>
    %145 = arith.mulf %138, %144 : vector<16x16xf32>
    %146 = arith.addf %133, %145 : vector<16x16xf32>
    %c80 = arith.constant 80 : index
    %147 = memref.load %arg2[%c80] : memref<108xf32, #tpu.memory_space<smem>>
    %148 = vector.broadcast %147 : f32 to vector<16x16xf32>
    %149 = arith.mulf %138, %148 : vector<16x16xf32>
    %150 = arith.addf %137, %149 : vector<16x16xf32>
    %c1_43 = arith.constant 1 : index
    %c0_44 = arith.constant 0 : index
    %c0_45 = arith.constant 0 : index
    %151 = vector.load %arg5[%c1_43, %c0_44, %c0_45] : memref<4x18x18xf32, #tpu.memory_space<vmem>>, vector<1x16x18xf32>
    %152 = vector.shape_cast %151 : vector<1x16x18xf32> to vector<16x18xf32>
    %153 = vector.extract_strided_slice %152 {offsets = [0, 0], sizes = [16, 16], strides = [1, 1]} : vector<16x18xf32> to vector<16x16xf32>
    %c9 = arith.constant 9 : index
    %154 = memref.load %arg2[%c9] : memref<108xf32, #tpu.memory_space<smem>>
    %155 = vector.broadcast %154 : f32 to vector<16x16xf32>
    %156 = arith.mulf %153, %155 : vector<16x16xf32>
    %157 = arith.addf %142, %156 : vector<16x16xf32>
    %c45 = arith.constant 45 : index
    %158 = memref.load %arg2[%c45] : memref<108xf32, #tpu.memory_space<smem>>
    %159 = vector.broadcast %158 : f32 to vector<16x16xf32>
    %160 = arith.mulf %153, %159 : vector<16x16xf32>
    %161 = arith.addf %146, %160 : vector<16x16xf32>
    %c81 = arith.constant 81 : index
    %162 = memref.load %arg2[%c81] : memref<108xf32, #tpu.memory_space<smem>>
    %163 = vector.broadcast %162 : f32 to vector<16x16xf32>
    %164 = arith.mulf %153, %163 : vector<16x16xf32>
    %165 = arith.addf %150, %164 : vector<16x16xf32>
    %166 = vector.extract_strided_slice %152 {offsets = [0, 1], sizes = [16, 16], strides = [1, 1]} : vector<16x18xf32> to vector<16x16xf32>
    %c10 = arith.constant 10 : index
    %167 = memref.load %arg2[%c10] : memref<108xf32, #tpu.memory_space<smem>>
    %168 = vector.broadcast %167 : f32 to vector<16x16xf32>
    %169 = arith.mulf %166, %168 : vector<16x16xf32>
    %170 = arith.addf %157, %169 : vector<16x16xf32>
    %c46 = arith.constant 46 : index
    %171 = memref.load %arg2[%c46] : memref<108xf32, #tpu.memory_space<smem>>
    %172 = vector.broadcast %171 : f32 to vector<16x16xf32>
    %173 = arith.mulf %166, %172 : vector<16x16xf32>
    %174 = arith.addf %161, %173 : vector<16x16xf32>
    %c82 = arith.constant 82 : index
    %175 = memref.load %arg2[%c82] : memref<108xf32, #tpu.memory_space<smem>>
    %176 = vector.broadcast %175 : f32 to vector<16x16xf32>
    %177 = arith.mulf %166, %176 : vector<16x16xf32>
    %178 = arith.addf %165, %177 : vector<16x16xf32>
    %179 = vector.extract_strided_slice %152 {offsets = [0, 2], sizes = [16, 16], strides = [1, 1]} : vector<16x18xf32> to vector<16x16xf32>
    %c11 = arith.constant 11 : index
    %180 = memref.load %arg2[%c11] : memref<108xf32, #tpu.memory_space<smem>>
    %181 = vector.broadcast %180 : f32 to vector<16x16xf32>
    %182 = arith.mulf %179, %181 : vector<16x16xf32>
    %183 = arith.addf %170, %182 : vector<16x16xf32>
    %c47 = arith.constant 47 : index
    %184 = memref.load %arg2[%c47] : memref<108xf32, #tpu.memory_space<smem>>
    %185 = vector.broadcast %184 : f32 to vector<16x16xf32>
    %186 = arith.mulf %179, %185 : vector<16x16xf32>
    %187 = arith.addf %174, %186 : vector<16x16xf32>
    %c83 = arith.constant 83 : index
    %188 = memref.load %arg2[%c83] : memref<108xf32, #tpu.memory_space<smem>>
    %189 = vector.broadcast %188 : f32 to vector<16x16xf32>
    %190 = arith.mulf %179, %189 : vector<16x16xf32>
    %191 = arith.addf %178, %190 : vector<16x16xf32>
    %c1_46 = arith.constant 1 : index
    %c1_47 = arith.constant 1 : index
    %c0_48 = arith.constant 0 : index
    %192 = vector.load %arg5[%c1_46, %c1_47, %c0_48] : memref<4x18x18xf32, #tpu.memory_space<vmem>>, vector<1x16x18xf32>
    %193 = vector.shape_cast %192 : vector<1x16x18xf32> to vector<16x18xf32>
    %194 = vector.extract_strided_slice %193 {offsets = [0, 0], sizes = [16, 16], strides = [1, 1]} : vector<16x18xf32> to vector<16x16xf32>
    %c12 = arith.constant 12 : index
    %195 = memref.load %arg2[%c12] : memref<108xf32, #tpu.memory_space<smem>>
    %196 = vector.broadcast %195 : f32 to vector<16x16xf32>
    %197 = arith.mulf %194, %196 : vector<16x16xf32>
    %198 = arith.addf %183, %197 : vector<16x16xf32>
    %c48 = arith.constant 48 : index
    %199 = memref.load %arg2[%c48] : memref<108xf32, #tpu.memory_space<smem>>
    %200 = vector.broadcast %199 : f32 to vector<16x16xf32>
    %201 = arith.mulf %194, %200 : vector<16x16xf32>
    %202 = arith.addf %187, %201 : vector<16x16xf32>
    %c84 = arith.constant 84 : index
    %203 = memref.load %arg2[%c84] : memref<108xf32, #tpu.memory_space<smem>>
    %204 = vector.broadcast %203 : f32 to vector<16x16xf32>
    %205 = arith.mulf %194, %204 : vector<16x16xf32>
    %206 = arith.addf %191, %205 : vector<16x16xf32>
    %207 = vector.extract_strided_slice %193 {offsets = [0, 1], sizes = [16, 16], strides = [1, 1]} : vector<16x18xf32> to vector<16x16xf32>
    %c13 = arith.constant 13 : index
    %208 = memref.load %arg2[%c13] : memref<108xf32, #tpu.memory_space<smem>>
    %209 = vector.broadcast %208 : f32 to vector<16x16xf32>
    %210 = arith.mulf %207, %209 : vector<16x16xf32>
    %211 = arith.addf %198, %210 : vector<16x16xf32>
    %c49 = arith.constant 49 : index
    %212 = memref.load %arg2[%c49] : memref<108xf32, #tpu.memory_space<smem>>
    %213 = vector.broadcast %212 : f32 to vector<16x16xf32>
    %214 = arith.mulf %207, %213 : vector<16x16xf32>
    %215 = arith.addf %202, %214 : vector<16x16xf32>
    %c85 = arith.constant 85 : index
    %216 = memref.load %arg2[%c85] : memref<108xf32, #tpu.memory_space<smem>>
    %217 = vector.broadcast %216 : f32 to vector<16x16xf32>
    %218 = arith.mulf %207, %217 : vector<16x16xf32>
    %219 = arith.addf %206, %218 : vector<16x16xf32>
    %220 = vector.extract_strided_slice %193 {offsets = [0, 2], sizes = [16, 16], strides = [1, 1]} : vector<16x18xf32> to vector<16x16xf32>
    %c14 = arith.constant 14 : index
    %221 = memref.load %arg2[%c14] : memref<108xf32, #tpu.memory_space<smem>>
    %222 = vector.broadcast %221 : f32 to vector<16x16xf32>
    %223 = arith.mulf %220, %222 : vector<16x16xf32>
    %224 = arith.addf %211, %223 : vector<16x16xf32>
    %c50 = arith.constant 50 : index
    %225 = memref.load %arg2[%c50] : memref<108xf32, #tpu.memory_space<smem>>
    %226 = vector.broadcast %225 : f32 to vector<16x16xf32>
    %227 = arith.mulf %220, %226 : vector<16x16xf32>
    %228 = arith.addf %215, %227 : vector<16x16xf32>
    %c86 = arith.constant 86 : index
    %229 = memref.load %arg2[%c86] : memref<108xf32, #tpu.memory_space<smem>>
    %230 = vector.broadcast %229 : f32 to vector<16x16xf32>
    %231 = arith.mulf %220, %230 : vector<16x16xf32>
    %232 = arith.addf %219, %231 : vector<16x16xf32>
    %c1_49 = arith.constant 1 : index
    %c2_50 = arith.constant 2 : index
    %c0_51 = arith.constant 0 : index
    %233 = vector.load %arg5[%c1_49, %c2_50, %c0_51] : memref<4x18x18xf32, #tpu.memory_space<vmem>>, vector<1x16x18xf32>
    %234 = vector.shape_cast %233 : vector<1x16x18xf32> to vector<16x18xf32>
    %235 = vector.extract_strided_slice %234 {offsets = [0, 0], sizes = [16, 16], strides = [1, 1]} : vector<16x18xf32> to vector<16x16xf32>
    %c15 = arith.constant 15 : index
    %236 = memref.load %arg2[%c15] : memref<108xf32, #tpu.memory_space<smem>>
    %237 = vector.broadcast %236 : f32 to vector<16x16xf32>
    %238 = arith.mulf %235, %237 : vector<16x16xf32>
    %239 = arith.addf %224, %238 : vector<16x16xf32>
    %c51 = arith.constant 51 : index
    %240 = memref.load %arg2[%c51] : memref<108xf32, #tpu.memory_space<smem>>
    %241 = vector.broadcast %240 : f32 to vector<16x16xf32>
    %242 = arith.mulf %235, %241 : vector<16x16xf32>
    %243 = arith.addf %228, %242 : vector<16x16xf32>
    %c87 = arith.constant 87 : index
    %244 = memref.load %arg2[%c87] : memref<108xf32, #tpu.memory_space<smem>>
    %245 = vector.broadcast %244 : f32 to vector<16x16xf32>
    %246 = arith.mulf %235, %245 : vector<16x16xf32>
    %247 = arith.addf %232, %246 : vector<16x16xf32>
    %248 = vector.extract_strided_slice %234 {offsets = [0, 1], sizes = [16, 16], strides = [1, 1]} : vector<16x18xf32> to vector<16x16xf32>
    %c16 = arith.constant 16 : index
    %249 = memref.load %arg2[%c16] : memref<108xf32, #tpu.memory_space<smem>>
    %250 = vector.broadcast %249 : f32 to vector<16x16xf32>
    %251 = arith.mulf %248, %250 : vector<16x16xf32>
    %252 = arith.addf %239, %251 : vector<16x16xf32>
    %c52 = arith.constant 52 : index
    %253 = memref.load %arg2[%c52] : memref<108xf32, #tpu.memory_space<smem>>
    %254 = vector.broadcast %253 : f32 to vector<16x16xf32>
    %255 = arith.mulf %248, %254 : vector<16x16xf32>
    %256 = arith.addf %243, %255 : vector<16x16xf32>
    %c88 = arith.constant 88 : index
    %257 = memref.load %arg2[%c88] : memref<108xf32, #tpu.memory_space<smem>>
    %258 = vector.broadcast %257 : f32 to vector<16x16xf32>
    %259 = arith.mulf %248, %258 : vector<16x16xf32>
    %260 = arith.addf %247, %259 : vector<16x16xf32>
    %261 = vector.extract_strided_slice %234 {offsets = [0, 2], sizes = [16, 16], strides = [1, 1]} : vector<16x18xf32> to vector<16x16xf32>
    %c17 = arith.constant 17 : index
    %262 = memref.load %arg2[%c17] : memref<108xf32, #tpu.memory_space<smem>>
    %263 = vector.broadcast %262 : f32 to vector<16x16xf32>
    %264 = arith.mulf %261, %263 : vector<16x16xf32>
    %265 = arith.addf %252, %264 : vector<16x16xf32>
    %c53 = arith.constant 53 : index
    %266 = memref.load %arg2[%c53] : memref<108xf32, #tpu.memory_space<smem>>
    %267 = vector.broadcast %266 : f32 to vector<16x16xf32>
    %268 = arith.mulf %261, %267 : vector<16x16xf32>
    %269 = arith.addf %256, %268 : vector<16x16xf32>
    %c89 = arith.constant 89 : index
    %270 = memref.load %arg2[%c89] : memref<108xf32, #tpu.memory_space<smem>>
    %271 = vector.broadcast %270 : f32 to vector<16x16xf32>
    %272 = arith.mulf %261, %271 : vector<16x16xf32>
    %273 = arith.addf %260, %272 : vector<16x16xf32>
    %c2_52 = arith.constant 2 : index
    %c0_53 = arith.constant 0 : index
    %c0_54 = arith.constant 0 : index
    %274 = vector.load %arg5[%c2_52, %c0_53, %c0_54] : memref<4x18x18xf32, #tpu.memory_space<vmem>>, vector<1x16x18xf32>
    %275 = vector.shape_cast %274 : vector<1x16x18xf32> to vector<16x18xf32>
    %276 = vector.extract_strided_slice %275 {offsets = [0, 0], sizes = [16, 16], strides = [1, 1]} : vector<16x18xf32> to vector<16x16xf32>
    %c18 = arith.constant 18 : index
    %277 = memref.load %arg2[%c18] : memref<108xf32, #tpu.memory_space<smem>>
    %278 = vector.broadcast %277 : f32 to vector<16x16xf32>
    %279 = arith.mulf %276, %278 : vector<16x16xf32>
    %280 = arith.addf %265, %279 : vector<16x16xf32>
    %c54 = arith.constant 54 : index
    %281 = memref.load %arg2[%c54] : memref<108xf32, #tpu.memory_space<smem>>
    %282 = vector.broadcast %281 : f32 to vector<16x16xf32>
    %283 = arith.mulf %276, %282 : vector<16x16xf32>
    %284 = arith.addf %269, %283 : vector<16x16xf32>
    %c90 = arith.constant 90 : index
    %285 = memref.load %arg2[%c90] : memref<108xf32, #tpu.memory_space<smem>>
    %286 = vector.broadcast %285 : f32 to vector<16x16xf32>
    %287 = arith.mulf %276, %286 : vector<16x16xf32>
    %288 = arith.addf %273, %287 : vector<16x16xf32>
    %289 = vector.extract_strided_slice %275 {offsets = [0, 1], sizes = [16, 16], strides = [1, 1]} : vector<16x18xf32> to vector<16x16xf32>
    %c19 = arith.constant 19 : index
    %290 = memref.load %arg2[%c19] : memref<108xf32, #tpu.memory_space<smem>>
    %291 = vector.broadcast %290 : f32 to vector<16x16xf32>
    %292 = arith.mulf %289, %291 : vector<16x16xf32>
    %293 = arith.addf %280, %292 : vector<16x16xf32>
    %c55 = arith.constant 55 : index
    %294 = memref.load %arg2[%c55] : memref<108xf32, #tpu.memory_space<smem>>
    %295 = vector.broadcast %294 : f32 to vector<16x16xf32>
    %296 = arith.mulf %289, %295 : vector<16x16xf32>
    %297 = arith.addf %284, %296 : vector<16x16xf32>
    %c91 = arith.constant 91 : index
    %298 = memref.load %arg2[%c91] : memref<108xf32, #tpu.memory_space<smem>>
    %299 = vector.broadcast %298 : f32 to vector<16x16xf32>
    %300 = arith.mulf %289, %299 : vector<16x16xf32>
    %301 = arith.addf %288, %300 : vector<16x16xf32>
    %302 = vector.extract_strided_slice %275 {offsets = [0, 2], sizes = [16, 16], strides = [1, 1]} : vector<16x18xf32> to vector<16x16xf32>
    %c20 = arith.constant 20 : index
    %303 = memref.load %arg2[%c20] : memref<108xf32, #tpu.memory_space<smem>>
    %304 = vector.broadcast %303 : f32 to vector<16x16xf32>
    %305 = arith.mulf %302, %304 : vector<16x16xf32>
    %306 = arith.addf %293, %305 : vector<16x16xf32>
    %c56 = arith.constant 56 : index
    %307 = memref.load %arg2[%c56] : memref<108xf32, #tpu.memory_space<smem>>
    %308 = vector.broadcast %307 : f32 to vector<16x16xf32>
    %309 = arith.mulf %302, %308 : vector<16x16xf32>
    %310 = arith.addf %297, %309 : vector<16x16xf32>
    %c92 = arith.constant 92 : index
    %311 = memref.load %arg2[%c92] : memref<108xf32, #tpu.memory_space<smem>>
    %312 = vector.broadcast %311 : f32 to vector<16x16xf32>
    %313 = arith.mulf %302, %312 : vector<16x16xf32>
    %314 = arith.addf %301, %313 : vector<16x16xf32>
    %c2_55 = arith.constant 2 : index
    %c1_56 = arith.constant 1 : index
    %c0_57 = arith.constant 0 : index
    %315 = vector.load %arg5[%c2_55, %c1_56, %c0_57] : memref<4x18x18xf32, #tpu.memory_space<vmem>>, vector<1x16x18xf32>
    %316 = vector.shape_cast %315 : vector<1x16x18xf32> to vector<16x18xf32>
    %317 = vector.extract_strided_slice %316 {offsets = [0, 0], sizes = [16, 16], strides = [1, 1]} : vector<16x18xf32> to vector<16x16xf32>
    %c21 = arith.constant 21 : index
    %318 = memref.load %arg2[%c21] : memref<108xf32, #tpu.memory_space<smem>>
    %319 = vector.broadcast %318 : f32 to vector<16x16xf32>
    %320 = arith.mulf %317, %319 : vector<16x16xf32>
    %321 = arith.addf %306, %320 : vector<16x16xf32>
    %c57 = arith.constant 57 : index
    %322 = memref.load %arg2[%c57] : memref<108xf32, #tpu.memory_space<smem>>
    %323 = vector.broadcast %322 : f32 to vector<16x16xf32>
    %324 = arith.mulf %317, %323 : vector<16x16xf32>
    %325 = arith.addf %310, %324 : vector<16x16xf32>
    %c93 = arith.constant 93 : index
    %326 = memref.load %arg2[%c93] : memref<108xf32, #tpu.memory_space<smem>>
    %327 = vector.broadcast %326 : f32 to vector<16x16xf32>
    %328 = arith.mulf %317, %327 : vector<16x16xf32>
    %329 = arith.addf %314, %328 : vector<16x16xf32>
    %330 = vector.extract_strided_slice %316 {offsets = [0, 1], sizes = [16, 16], strides = [1, 1]} : vector<16x18xf32> to vector<16x16xf32>
    %c22 = arith.constant 22 : index
    %331 = memref.load %arg2[%c22] : memref<108xf32, #tpu.memory_space<smem>>
    %332 = vector.broadcast %331 : f32 to vector<16x16xf32>
    %333 = arith.mulf %330, %332 : vector<16x16xf32>
    %334 = arith.addf %321, %333 : vector<16x16xf32>
    %c58 = arith.constant 58 : index
    %335 = memref.load %arg2[%c58] : memref<108xf32, #tpu.memory_space<smem>>
    %336 = vector.broadcast %335 : f32 to vector<16x16xf32>
    %337 = arith.mulf %330, %336 : vector<16x16xf32>
    %338 = arith.addf %325, %337 : vector<16x16xf32>
    %c94 = arith.constant 94 : index
    %339 = memref.load %arg2[%c94] : memref<108xf32, #tpu.memory_space<smem>>
    %340 = vector.broadcast %339 : f32 to vector<16x16xf32>
    %341 = arith.mulf %330, %340 : vector<16x16xf32>
    %342 = arith.addf %329, %341 : vector<16x16xf32>
    %343 = vector.extract_strided_slice %316 {offsets = [0, 2], sizes = [16, 16], strides = [1, 1]} : vector<16x18xf32> to vector<16x16xf32>
    %c23 = arith.constant 23 : index
    %344 = memref.load %arg2[%c23] : memref<108xf32, #tpu.memory_space<smem>>
    %345 = vector.broadcast %344 : f32 to vector<16x16xf32>
    %346 = arith.mulf %343, %345 : vector<16x16xf32>
    %347 = arith.addf %334, %346 : vector<16x16xf32>
    %c59 = arith.constant 59 : index
    %348 = memref.load %arg2[%c59] : memref<108xf32, #tpu.memory_space<smem>>
    %349 = vector.broadcast %348 : f32 to vector<16x16xf32>
    %350 = arith.mulf %343, %349 : vector<16x16xf32>
    %351 = arith.addf %338, %350 : vector<16x16xf32>
    %c95 = arith.constant 95 : index
    %352 = memref.load %arg2[%c95] : memref<108xf32, #tpu.memory_space<smem>>
    %353 = vector.broadcast %352 : f32 to vector<16x16xf32>
    %354 = arith.mulf %343, %353 : vector<16x16xf32>
    %355 = arith.addf %342, %354 : vector<16x16xf32>
    %c2_58 = arith.constant 2 : index
    %c2_59 = arith.constant 2 : index
    %c0_60 = arith.constant 0 : index
    %356 = vector.load %arg5[%c2_58, %c2_59, %c0_60] : memref<4x18x18xf32, #tpu.memory_space<vmem>>, vector<1x16x18xf32>
    %357 = vector.shape_cast %356 : vector<1x16x18xf32> to vector<16x18xf32>
    %358 = vector.extract_strided_slice %357 {offsets = [0, 0], sizes = [16, 16], strides = [1, 1]} : vector<16x18xf32> to vector<16x16xf32>
    %c24 = arith.constant 24 : index
    %359 = memref.load %arg2[%c24] : memref<108xf32, #tpu.memory_space<smem>>
    %360 = vector.broadcast %359 : f32 to vector<16x16xf32>
    %361 = arith.mulf %358, %360 : vector<16x16xf32>
    %362 = arith.addf %347, %361 : vector<16x16xf32>
    %c60 = arith.constant 60 : index
    %363 = memref.load %arg2[%c60] : memref<108xf32, #tpu.memory_space<smem>>
    %364 = vector.broadcast %363 : f32 to vector<16x16xf32>
    %365 = arith.mulf %358, %364 : vector<16x16xf32>
    %366 = arith.addf %351, %365 : vector<16x16xf32>
    %c96 = arith.constant 96 : index
    %367 = memref.load %arg2[%c96] : memref<108xf32, #tpu.memory_space<smem>>
    %368 = vector.broadcast %367 : f32 to vector<16x16xf32>
    %369 = arith.mulf %358, %368 : vector<16x16xf32>
    %370 = arith.addf %355, %369 : vector<16x16xf32>
    %371 = vector.extract_strided_slice %357 {offsets = [0, 1], sizes = [16, 16], strides = [1, 1]} : vector<16x18xf32> to vector<16x16xf32>
    %c25 = arith.constant 25 : index
    %372 = memref.load %arg2[%c25] : memref<108xf32, #tpu.memory_space<smem>>
    %373 = vector.broadcast %372 : f32 to vector<16x16xf32>
    %374 = arith.mulf %371, %373 : vector<16x16xf32>
    %375 = arith.addf %362, %374 : vector<16x16xf32>
    %c61 = arith.constant 61 : index
    %376 = memref.load %arg2[%c61] : memref<108xf32, #tpu.memory_space<smem>>
    %377 = vector.broadcast %376 : f32 to vector<16x16xf32>
    %378 = arith.mulf %371, %377 : vector<16x16xf32>
    %379 = arith.addf %366, %378 : vector<16x16xf32>
    %c97 = arith.constant 97 : index
    %380 = memref.load %arg2[%c97] : memref<108xf32, #tpu.memory_space<smem>>
    %381 = vector.broadcast %380 : f32 to vector<16x16xf32>
    %382 = arith.mulf %371, %381 : vector<16x16xf32>
    %383 = arith.addf %370, %382 : vector<16x16xf32>
    %384 = vector.extract_strided_slice %357 {offsets = [0, 2], sizes = [16, 16], strides = [1, 1]} : vector<16x18xf32> to vector<16x16xf32>
    %c26 = arith.constant 26 : index
    %385 = memref.load %arg2[%c26] : memref<108xf32, #tpu.memory_space<smem>>
    %386 = vector.broadcast %385 : f32 to vector<16x16xf32>
    %387 = arith.mulf %384, %386 : vector<16x16xf32>
    %388 = arith.addf %375, %387 : vector<16x16xf32>
    %c62 = arith.constant 62 : index
    %389 = memref.load %arg2[%c62] : memref<108xf32, #tpu.memory_space<smem>>
    %390 = vector.broadcast %389 : f32 to vector<16x16xf32>
    %391 = arith.mulf %384, %390 : vector<16x16xf32>
    %392 = arith.addf %379, %391 : vector<16x16xf32>
    %c98 = arith.constant 98 : index
    %393 = memref.load %arg2[%c98] : memref<108xf32, #tpu.memory_space<smem>>
    %394 = vector.broadcast %393 : f32 to vector<16x16xf32>
    %395 = arith.mulf %384, %394 : vector<16x16xf32>
    %396 = arith.addf %383, %395 : vector<16x16xf32>
    %c3_61 = arith.constant 3 : index
    %c0_62 = arith.constant 0 : index
    %c0_63 = arith.constant 0 : index
    %397 = vector.load %arg5[%c3_61, %c0_62, %c0_63] : memref<4x18x18xf32, #tpu.memory_space<vmem>>, vector<1x16x18xf32>
    %398 = vector.shape_cast %397 : vector<1x16x18xf32> to vector<16x18xf32>
    %399 = vector.extract_strided_slice %398 {offsets = [0, 0], sizes = [16, 16], strides = [1, 1]} : vector<16x18xf32> to vector<16x16xf32>
    %c27 = arith.constant 27 : index
    %400 = memref.load %arg2[%c27] : memref<108xf32, #tpu.memory_space<smem>>
    %401 = vector.broadcast %400 : f32 to vector<16x16xf32>
    %402 = arith.mulf %399, %401 : vector<16x16xf32>
    %403 = arith.addf %388, %402 : vector<16x16xf32>
    %c63 = arith.constant 63 : index
    %404 = memref.load %arg2[%c63] : memref<108xf32, #tpu.memory_space<smem>>
    %405 = vector.broadcast %404 : f32 to vector<16x16xf32>
    %406 = arith.mulf %399, %405 : vector<16x16xf32>
    %407 = arith.addf %392, %406 : vector<16x16xf32>
    %c99 = arith.constant 99 : index
    %408 = memref.load %arg2[%c99] : memref<108xf32, #tpu.memory_space<smem>>
    %409 = vector.broadcast %408 : f32 to vector<16x16xf32>
    %410 = arith.mulf %399, %409 : vector<16x16xf32>
    %411 = arith.addf %396, %410 : vector<16x16xf32>
    %412 = vector.extract_strided_slice %398 {offsets = [0, 1], sizes = [16, 16], strides = [1, 1]} : vector<16x18xf32> to vector<16x16xf32>
    %c28 = arith.constant 28 : index
    %413 = memref.load %arg2[%c28] : memref<108xf32, #tpu.memory_space<smem>>
    %414 = vector.broadcast %413 : f32 to vector<16x16xf32>
    %415 = arith.mulf %412, %414 : vector<16x16xf32>
    %416 = arith.addf %403, %415 : vector<16x16xf32>
    %c64 = arith.constant 64 : index
    %417 = memref.load %arg2[%c64] : memref<108xf32, #tpu.memory_space<smem>>
    %418 = vector.broadcast %417 : f32 to vector<16x16xf32>
    %419 = arith.mulf %412, %418 : vector<16x16xf32>
    %420 = arith.addf %407, %419 : vector<16x16xf32>
    %c100 = arith.constant 100 : index
    %421 = memref.load %arg2[%c100] : memref<108xf32, #tpu.memory_space<smem>>
    %422 = vector.broadcast %421 : f32 to vector<16x16xf32>
    %423 = arith.mulf %412, %422 : vector<16x16xf32>
    %424 = arith.addf %411, %423 : vector<16x16xf32>
    %425 = vector.extract_strided_slice %398 {offsets = [0, 2], sizes = [16, 16], strides = [1, 1]} : vector<16x18xf32> to vector<16x16xf32>
    %c29 = arith.constant 29 : index
    %426 = memref.load %arg2[%c29] : memref<108xf32, #tpu.memory_space<smem>>
    %427 = vector.broadcast %426 : f32 to vector<16x16xf32>
    %428 = arith.mulf %425, %427 : vector<16x16xf32>
    %429 = arith.addf %416, %428 : vector<16x16xf32>
    %c65 = arith.constant 65 : index
    %430 = memref.load %arg2[%c65] : memref<108xf32, #tpu.memory_space<smem>>
    %431 = vector.broadcast %430 : f32 to vector<16x16xf32>
    %432 = arith.mulf %425, %431 : vector<16x16xf32>
    %433 = arith.addf %420, %432 : vector<16x16xf32>
    %c101 = arith.constant 101 : index
    %434 = memref.load %arg2[%c101] : memref<108xf32, #tpu.memory_space<smem>>
    %435 = vector.broadcast %434 : f32 to vector<16x16xf32>
    %436 = arith.mulf %425, %435 : vector<16x16xf32>
    %437 = arith.addf %424, %436 : vector<16x16xf32>
    %c3_64 = arith.constant 3 : index
    %c1_65 = arith.constant 1 : index
    %c0_66 = arith.constant 0 : index
    %438 = vector.load %arg5[%c3_64, %c1_65, %c0_66] : memref<4x18x18xf32, #tpu.memory_space<vmem>>, vector<1x16x18xf32>
    %439 = vector.shape_cast %438 : vector<1x16x18xf32> to vector<16x18xf32>
    %440 = vector.extract_strided_slice %439 {offsets = [0, 0], sizes = [16, 16], strides = [1, 1]} : vector<16x18xf32> to vector<16x16xf32>
    %c30 = arith.constant 30 : index
    %441 = memref.load %arg2[%c30] : memref<108xf32, #tpu.memory_space<smem>>
    %442 = vector.broadcast %441 : f32 to vector<16x16xf32>
    %443 = arith.mulf %440, %442 : vector<16x16xf32>
    %444 = arith.addf %429, %443 : vector<16x16xf32>
    %c66 = arith.constant 66 : index
    %445 = memref.load %arg2[%c66] : memref<108xf32, #tpu.memory_space<smem>>
    %446 = vector.broadcast %445 : f32 to vector<16x16xf32>
    %447 = arith.mulf %440, %446 : vector<16x16xf32>
    %448 = arith.addf %433, %447 : vector<16x16xf32>
    %c102 = arith.constant 102 : index
    %449 = memref.load %arg2[%c102] : memref<108xf32, #tpu.memory_space<smem>>
    %450 = vector.broadcast %449 : f32 to vector<16x16xf32>
    %451 = arith.mulf %440, %450 : vector<16x16xf32>
    %452 = arith.addf %437, %451 : vector<16x16xf32>
    %453 = vector.extract_strided_slice %439 {offsets = [0, 1], sizes = [16, 16], strides = [1, 1]} : vector<16x18xf32> to vector<16x16xf32>
    %c31 = arith.constant 31 : index
    %454 = memref.load %arg2[%c31] : memref<108xf32, #tpu.memory_space<smem>>
    %455 = vector.broadcast %454 : f32 to vector<16x16xf32>
    %456 = arith.mulf %453, %455 : vector<16x16xf32>
    %457 = arith.addf %444, %456 : vector<16x16xf32>
    %c67 = arith.constant 67 : index
    %458 = memref.load %arg2[%c67] : memref<108xf32, #tpu.memory_space<smem>>
    %459 = vector.broadcast %458 : f32 to vector<16x16xf32>
    %460 = arith.mulf %453, %459 : vector<16x16xf32>
    %461 = arith.addf %448, %460 : vector<16x16xf32>
    %c103 = arith.constant 103 : index
    %462 = memref.load %arg2[%c103] : memref<108xf32, #tpu.memory_space<smem>>
    %463 = vector.broadcast %462 : f32 to vector<16x16xf32>
    %464 = arith.mulf %453, %463 : vector<16x16xf32>
    %465 = arith.addf %452, %464 : vector<16x16xf32>
    %466 = vector.extract_strided_slice %439 {offsets = [0, 2], sizes = [16, 16], strides = [1, 1]} : vector<16x18xf32> to vector<16x16xf32>
    %c32 = arith.constant 32 : index
    %467 = memref.load %arg2[%c32] : memref<108xf32, #tpu.memory_space<smem>>
    %468 = vector.broadcast %467 : f32 to vector<16x16xf32>
    %469 = arith.mulf %466, %468 : vector<16x16xf32>
    %470 = arith.addf %457, %469 : vector<16x16xf32>
    %c68 = arith.constant 68 : index
    %471 = memref.load %arg2[%c68] : memref<108xf32, #tpu.memory_space<smem>>
    %472 = vector.broadcast %471 : f32 to vector<16x16xf32>
    %473 = arith.mulf %466, %472 : vector<16x16xf32>
    %474 = arith.addf %461, %473 : vector<16x16xf32>
    %c104 = arith.constant 104 : index
    %475 = memref.load %arg2[%c104] : memref<108xf32, #tpu.memory_space<smem>>
    %476 = vector.broadcast %475 : f32 to vector<16x16xf32>
    %477 = arith.mulf %466, %476 : vector<16x16xf32>
    %478 = arith.addf %465, %477 : vector<16x16xf32>
    %c3_67 = arith.constant 3 : index
    %c2_68 = arith.constant 2 : index
    %c0_69 = arith.constant 0 : index
    %479 = vector.load %arg5[%c3_67, %c2_68, %c0_69] : memref<4x18x18xf32, #tpu.memory_space<vmem>>, vector<1x16x18xf32>
    %480 = vector.shape_cast %479 : vector<1x16x18xf32> to vector<16x18xf32>
    %481 = vector.extract_strided_slice %480 {offsets = [0, 0], sizes = [16, 16], strides = [1, 1]} : vector<16x18xf32> to vector<16x16xf32>
    %c33 = arith.constant 33 : index
    %482 = memref.load %arg2[%c33] : memref<108xf32, #tpu.memory_space<smem>>
    %483 = vector.broadcast %482 : f32 to vector<16x16xf32>
    %484 = arith.mulf %481, %483 : vector<16x16xf32>
    %485 = arith.addf %470, %484 : vector<16x16xf32>
    %c69 = arith.constant 69 : index
    %486 = memref.load %arg2[%c69] : memref<108xf32, #tpu.memory_space<smem>>
    %487 = vector.broadcast %486 : f32 to vector<16x16xf32>
    %488 = arith.mulf %481, %487 : vector<16x16xf32>
    %489 = arith.addf %474, %488 : vector<16x16xf32>
    %c105 = arith.constant 105 : index
    %490 = memref.load %arg2[%c105] : memref<108xf32, #tpu.memory_space<smem>>
    %491 = vector.broadcast %490 : f32 to vector<16x16xf32>
    %492 = arith.mulf %481, %491 : vector<16x16xf32>
    %493 = arith.addf %478, %492 : vector<16x16xf32>
    %494 = vector.extract_strided_slice %480 {offsets = [0, 1], sizes = [16, 16], strides = [1, 1]} : vector<16x18xf32> to vector<16x16xf32>
    %c34 = arith.constant 34 : index
    %495 = memref.load %arg2[%c34] : memref<108xf32, #tpu.memory_space<smem>>
    %496 = vector.broadcast %495 : f32 to vector<16x16xf32>
    %497 = arith.mulf %494, %496 : vector<16x16xf32>
    %498 = arith.addf %485, %497 : vector<16x16xf32>
    %c70 = arith.constant 70 : index
    %499 = memref.load %arg2[%c70] : memref<108xf32, #tpu.memory_space<smem>>
    %500 = vector.broadcast %499 : f32 to vector<16x16xf32>
    %501 = arith.mulf %494, %500 : vector<16x16xf32>
    %502 = arith.addf %489, %501 : vector<16x16xf32>
    %c106 = arith.constant 106 : index
    %503 = memref.load %arg2[%c106] : memref<108xf32, #tpu.memory_space<smem>>
    %504 = vector.broadcast %503 : f32 to vector<16x16xf32>
    %505 = arith.mulf %494, %504 : vector<16x16xf32>
    %506 = arith.addf %493, %505 : vector<16x16xf32>
    %507 = vector.extract_strided_slice %480 {offsets = [0, 2], sizes = [16, 16], strides = [1, 1]} : vector<16x18xf32> to vector<16x16xf32>
    %c35 = arith.constant 35 : index
    %508 = memref.load %arg2[%c35] : memref<108xf32, #tpu.memory_space<smem>>
    %509 = vector.broadcast %508 : f32 to vector<16x16xf32>
    %510 = arith.mulf %507, %509 : vector<16x16xf32>
    %511 = arith.addf %498, %510 : vector<16x16xf32>
    %c71 = arith.constant 71 : index
    %512 = memref.load %arg2[%c71] : memref<108xf32, #tpu.memory_space<smem>>
    %513 = vector.broadcast %512 : f32 to vector<16x16xf32>
    %514 = arith.mulf %507, %513 : vector<16x16xf32>
    %515 = arith.addf %502, %514 : vector<16x16xf32>
    %c107 = arith.constant 107 : index
    %516 = memref.load %arg2[%c107] : memref<108xf32, #tpu.memory_space<smem>>
    %517 = vector.broadcast %516 : f32 to vector<16x16xf32>
    %518 = arith.mulf %507, %517 : vector<16x16xf32>
    %519 = arith.addf %506, %518 : vector<16x16xf32>
    %cst_70 = arith.constant 0.000000e+00 : f32
    %520 = vector.broadcast %cst_70 : f32 to vector<16x16xf32>
    %521 = arith.maximumf %511, %520 : vector<16x16xf32>
    %c0_71 = arith.constant 0 : index
    %c0_72 = arith.constant 0 : index
    %c0_73 = arith.constant 0 : index
    %c0_74 = arith.constant 0 : index
    %522 = vector.load %arg4[%c0_71, %c0_72, %c0_73, %c0_74] : memref<1x3x16x16xf32, #tpu.memory_space<vmem>>, vector<1x1x16x16xf32>
    %523 = vector.shape_cast %522 : vector<1x1x16x16xf32> to vector<16x16xf32>
    %524 = vector.shape_cast %521 : vector<16x16xf32> to vector<1x1x16x16xf32>
    tpu.vector_store %arg4[%c0_71, %c0_72, %c0_73, %c0_74], %524 {strides = array<i32>} : memref<1x3x16x16xf32, #tpu.memory_space<vmem>>, vector<1x1x16x16xf32>,
    %cst_75 = arith.constant 0.000000e+00 : f32
    %525 = vector.broadcast %cst_75 : f32 to vector<16x16xf32>
    %526 = arith.maximumf %515, %525 : vector<16x16xf32>
    %c0_76 = arith.constant 0 : index
    %c1_77 = arith.constant 1 : index
    %c0_78 = arith.constant 0 : index
    %c0_79 = arith.constant 0 : index
    %527 = vector.load %arg4[%c0_76, %c1_77, %c0_78, %c0_79] : memref<1x3x16x16xf32, #tpu.memory_space<vmem>>, vector<1x1x16x16xf32>
    %528 = vector.shape_cast %527 : vector<1x1x16x16xf32> to vector<16x16xf32>
    %529 = vector.shape_cast %526 : vector<16x16xf32> to vector<1x1x16x16xf32>
    tpu.vector_store %arg4[%c0_76, %c1_77, %c0_78, %c0_79], %529 {strides = array<i32>} : memref<1x3x16x16xf32, #tpu.memory_space<vmem>>, vector<1x1x16x16xf32>,
    %cst_80 = arith.constant 0.000000e+00 : f32
    %530 = vector.broadcast %cst_80 : f32 to vector<16x16xf32>
    %531 = arith.maximumf %519, %530 : vector<16x16xf32>
    %c0_81 = arith.constant 0 : index
    %c2_82 = arith.constant 2 : index
    %c0_83 = arith.constant 0 : index
    %c0_84 = arith.constant 0 : index
    %532 = vector.load %arg4[%c0_81, %c2_82, %c0_83, %c0_84] : memref<1x3x16x16xf32, #tpu.memory_space<vmem>>, vector<1x1x16x16xf32>
    %533 = vector.shape_cast %532 : vector<1x1x16x16xf32> to vector<16x16xf32>
    %534 = vector.shape_cast %531 : vector<16x16xf32> to vector<1x1x16x16xf32>
    tpu.vector_store %arg4[%c0_81, %c2_82, %c0_83, %c0_84], %534 {strides = array<i32>} : memref<1x3x16x16xf32, #tpu.memory_space<vmem>>, vector<1x1x16x16xf32>,
    return
  }
  func.func @transform_0(%arg0: i32) -> (i32, i32, i32, i32) {
    %c0_i32 = arith.constant 0 : i32
    %c0_i32_0 = arith.constant 0 : i32
    %c0_i32_1 = arith.constant 0 : i32
    %c0_i32_2 = arith.constant 0 : i32
    return %arg0, %c0_i32, %c0_i32_0, %c0_i32_1 : i32, i32, i32, i32
  }
  func.func @transform_1(%arg0: i32) -> i32 {
    %c0_i32 = arith.constant 0 : i32
    %c0_i32_0 = arith.constant 0 : i32
    return %c0_i32 : i32
  }
  func.func @transform_2(%arg0: i32) -> i32 {
    %c0_i32 = arith.constant 0 : i32
    %c0_i32_0 = arith.constant 0 : i32
    return %c0_i32 : i32
  }
  func.func @transform_3(%arg0: i32) -> (i32, i32, i32, i32) {
    %c0_i32 = arith.constant 0 : i32
    %c0_i32_0 = arith.constant 0 : i32
    %c0_i32_1 = arith.constant 0 : i32
    %c0_i32_2 = arith.constant 0 : i32
    return %arg0, %c0_i32, %c0_i32_0, %c0_i32_1 : i32, i32, i32, i32
  }
}

</mosaic_0001>

<bundles_post_ra>
// kernel: single_conv_forward.1
= control target key start
LH: loop header
LB: loop body
LE: loop exit
PB: predicated region body
PF: predicated region fallthrough
CT: control target
= control target key end

     0   :  { %8 = vsyncpa [#allocation5], 0  ;;  %s2788_s0 = inlined_call_operand.vmem [shape: f32[2,4,16,16], index: 0, kind: input, shape index: {}]   ;;  %s2789_s1 = inlined_call_operand.vmem [shape: f32[108], index: 1, kind: input, shape index: {}]   ;;  %s2790_s2 = inlined_call_operand.vmem [shape: f32[3], index: 2, kind: input, shape index: {}]   ;;  %s2791_s3 = inlined_call_operand.hbm [shape: f32[2,3,16,16], index: 3, kind: output, shape index: {}]  }
   0x1   :  { %9 = vsyncpa [#allocation7], 0 }
   0x2   :  { %10 = vsyncpa [#allocation4], 0 }
   0x3   :  { %12 = vsyncpa [#allocation4 + $0x1], 0  ;;  %s1964_s12 = smov 0   ;;  %s1966_s13 = smov 0  }
   0x4   :  { %s1968_s14 = smov 0   ;;  %s1970_s15 = smov 0  }
   0x5 LB: > { %s1985_s16 = sadd.s32 4294967295, %s1933_s15   ;;  %s1632_s17 = sadd.s32 4294967294, %s1933_s15   ;;  %s1933_s15 = sphi %s1970_s15, %s2809_s15   ;;  %s1929_s14 = sphi %s1968_s14, %s2808_s14   ;;  %s1925_s13 = sphi %s1966_s13, %s2807_s13   ;;  %s1921_s12 = sphi %s1964_s12, %s2806_s12  }
   0x6   : > { %s1989_s18 = sadd.s32 1, %s1933_s15   ;;  %s93_s19 = sadd.s32 1, %s1929_s14 }
   0x7   : > { %s90_s20 = ssub.s32 %s1933_s15, %s1989_s18  ;;  %p103_p0 = scmp.ne.s32.totalorder %s1929_s14, %s1925_s13 }
   0x8   : > { %p91_p1 = scmp.eq.s32.totalorder %s90_s20, 0  ;;  %p104_p2 = scmp.eq.s32.totalorder %s1985_s16, 1 }
   0x9   : > { %p109_p3 = scmp.ne.s32.totalorder %s1925_s13, %s1921_s12  ;;  %p110_p4 = scmp.eq.s32.totalorder %s1632_s17, 1 }
   0xa   : > { %s2000_s21 = scalar_select %p91_p1, %s1929_s14, %s93_s19  }
   0xb   : > { %p2002_p5 = por %p104_p2, %p103_p0  ;;  %p2006_p6 = por %p110_p4, %p109_p3 }
   0xc   : > { %p1633_p7 = scmp.ge.s32.totalorder %s1933_s15, 1  ;;  %p117_p8 = scmp.lt.s32.totalorder %s1933_s15, 3 }
   0xd   : > { %s2795_s22 = scalar_select %p2002_p5, 1, 0 }
   0xe   : > { %s2796_s23 = scalar_select %p2006_p6, 1, 0 }
   0xf   : > { %p2792_p9 = scmp.eq.s32.totalorder %s1985_s16, 0  ;;  %p2013_p10 = pnand %p1633_p7, %p117_p8 }
  0x10   : > { %s130_s27 = sshll.u32 %s2789_s1, 4  ;;  %s141_s30 = sshll.u32 %s2790_s2, 4  ;;  %s131_s27 = int_to_ptr.vmem [resolvable:$true] %s130_s27  ;;  %s142_s30 = int_to_ptr.vmem [resolvable:$true] %s141_s30 }
  0x11   : > { %s2797_s24 = scalar_select %p2013_p10, 1, 0 }
  0x12   : > { %p1777_p11 = pneg %p2013_p10  ;;  %s1833_s5 = scalar_lea.vmem %s131_s27, 16 }
  0x13   : > { %p1834_p13 = scmp.ne.s32.totalorder %s131_s27, %s1833_s5  ;;  %p1841_p3 = scmp.lt.s32.totalorder %s131_s27, %s131_s27 }
  0x14   : > { %p2027_p12 = pnand %p2792_p9, %p1777_p11  ;;  %p1842_p4 = scmp.lt.s32.totalorder %s1833_s5, %s1833_s5 }
  0x16   : > { %p1835_p0 = pneg %p2027_p12  ;;  %p1843_p7 = por %p1842_p4, %p1841_p3 }
  0x18   : > { %p1836_p1 = pnand %p1835_p0, %p1834_p13 }
  0x1a   : > { %p1837_p2 = pneg %p1836_p1 }
  0x1c   : > { %p1844_p8 = pnand %p1843_p7, %p1837_p2 }
  0x1e   : > { %1847 = shalt.err (!%p1844_p8)
}
  0x1f   : > { %s1935_s6 = smov [#allocation3]   ;;  %s1848_s7 = scalar_lea.vmem %s142_s30, 16 }
  0x20   : > { %1780 = dma.vmem_to_smem (!%p2027_p12), %s131_s27, 16, %s1935_s6, [#allocation5]  }
  0x21   : > { %p1849_p11 = scmp.ne.s32.totalorder %s142_s30, %s1848_s7  ;;  %p1856_p5 = scmp.lt.s32.totalorder %s142_s30, %s142_s30 }
  0x22   : > { %p1857_p10 = scmp.lt.s32.totalorder %s1848_s7, %s1848_s7 }
  0x23   : > { %p1851_p9 = pnand %p1849_p11, %p1835_p0 }
  0x24   : > { %p1858_p13 = por %p1857_p10, %p1856_p5 }
  0x25   : > { %p1852_p6 = pneg %p1851_p9 }
  0x27   : > { %p1859_p1 = pnand %p1858_p13, %p1852_p6 }
  0x29   : > { %1862 = shalt.err (!%p1859_p1)
}
  0x2a   : > { %s1936_s8 = smov [#allocation6]   ;;  %p2799_p2 = scmp.ne.s32.totalorder %s2797_s24, 0 }
  0x2b   : > { %1783 = dma.vmem_to_smem (!%p2027_p12), %s142_s30, 16, %s1936_s8, [#allocation7]  }
  0x2c   : > { %162 = sbr.rel (%p2799_p2) target bundleno = 612 (0x264), region = 32  ;;  %p2800_p3 = scmp.eq.s32.totalorder (!%p2799_p2), %s1985_s16, 0 }
  0x33   : > { %1908 = dma.done.wait (%p2800_p3), [#allocation5], 16   ;;  %p2801_p4 = pmov %p2800_p3 }
  0x34   : > { %p2802_p9 = pmov %p2800_p3 }
  0x35   : > { %1910 = vsyncadd (%p2801_p4), [#allocation5], 4294967280 }
  0x36   : > { %1912 = dma.done.wait (%p2802_p9), [#allocation7], 16   ;;  %p2803_p5 = pmov %p2800_p3 }
  0x38   : > { %1914 = vsyncadd (%p2803_p5), [#allocation7], 4294967280 }
  0x39   : > { %172 = sfence }
  0x3a   : > { %p191_p6 = scmp.lt.s32.totalorder %s1985_s16, 1  ;;  %vm196_vm0 = vcmask 146432   ;;  %vm199_vm1 = vcmask 140288   ;;  %v1937_v0 = vmov 0.0   ;;  %s1938_s20 = smov 1   ;;  %vm220_vm2 = vcmask 138248  }
  0x3b   : > { %197 = vst.msk [vmem:[#allocation2] sm:$0xff] %vm196_vm0, %v1937_v0  ;;  %198 = vst.msk [vmem:[#allocation2 + $0x8] sm:$0xff] %vm196_vm0, %v1937_v0  ;;  %s1652_s24 = sld [smem:[#allocation3 + $0x1]]  ;;  %s1653_s25 = sld [smem:[#allocation3 + $0x25]]  ;;  %vm1521_vm3 = vcmask 130048  }
  0x3c   : > { %201 = vst.msk [vmem:[#allocation2 + $0x18] sm:$0xff] %vm196_vm0, %v1937_v0  ;;  %202 = vst.msk [vmem:[#allocation2 + $0x20] sm:$0xff] %vm196_vm0, %v1937_v0  ;;  %s192_s9 = scalar_select %p191_p6, %s1985_s16, 1 }
  0x3d   : > { %204 = vst.msk [vmem:[#allocation2 + $0x30] sm:$0xff] %vm196_vm0, %v1937_v0  ;;  %205 = vst.msk [vmem:[#allocation2 + $0x38] sm:$0xff] %vm196_vm0, %v1937_v0  ;;  %s1654_s26 = sld [smem:[#allocation3 + $0x49]]  ;;  %s1655_s27 = sld [smem:[#allocation3 + $0x2]] }
  0x3e   : > { %207 = vst.msk [vmem:[#allocation2 + $0x48] sm:$0xff] %vm196_vm0, %v1937_v0  ;;  %208 = vst.msk [vmem:[#allocation2 + $0x50] sm:$0xff] %vm196_vm0, %v1937_v0  ;;  %s1764_s10 = sshll.u32 %s192_s9, 6  ;;  %s1939_s28 = smov 127  }
  0x3f   : > { %200 = vst.msk [vmem:[#allocation2 + $0x10] sm:$0x3] %vm199_vm1, %v1937_v0  ;;  %203 = vst.msk [vmem:[#allocation2 + $0x28] sm:$0x3] %vm199_vm1, %v1937_v0  ;;  %s195_s19 = scalar_lea.vmem %s2788_s0, %s1764_s10  ;;  %s1656_s29 = sld [smem:[#allocation3 + $0x26]] }
  0x40   : > { %206 = vst.msk [vmem:[#allocation2 + $0x40] sm:$0x3] %vm199_vm1, %v1937_v0  ;;  %209 = vst.msk [vmem:[#allocation2 + $0x58] sm:$0x3] %vm199_vm1, %v1937_v0  ;;  %v210_v1 = vld [vmem:[%s195_s19] sm:$0xff]  ;;  %v1642_v2 = vld [vmem:[%s195_s19 + $0x10] sm:$0xff] }
  0x41   : > { %214 = vrot.lane.b32.xlu0 %v210_v1, %s1938_s20  ;;  %228 = vrot.lane.b32.xlu1 %v1642_v2, %s1938_s20  ;;  %v211_v3 = vld [vmem:[%s195_s19 + $0x8] sm:$0xff]  ;;  %v1643_v4 = vld [vmem:[%s195_s19 + $0x18] sm:$0xff]  ;;  %s1657_s30 = sld [smem:[#allocation3 + $0x4a]]  ;;  %s1661_s4 = sld [smem:[#allocation3 + $0x4]] }
  0x42   : > { %v1644_v5 = vld [vmem:[%s195_s19 + $0x20] sm:$0xff]  ;;  %v1645_v6 = vld [vmem:[%s195_s19 + $0x28] sm:$0xff]  ;;  %v1646_v7 = vld [vmem:[%s195_s19 + $0x30] sm:$0xff]  ;;  %v292_v13 = vstv %s1652_s24  ;;  %s1940_s5 = smov 126   ;;  %s1662_s6 = sld [smem:[#allocation3 + $0x28]] }
  0x43   : > { %v1647_v8 = vld [vmem:[%s195_s19 + $0x38] sm:$0xff]  ;;  %v306_v18 = vstv %s1653_s25  ;;  %v320_v24 = vstv %s1654_s26  ;;  %v334_v27 = vstv %s1655_s27  ;;  %s1663_s7 = sld [smem:[#allocation3 + $0x4c]]  ;;  %s1664_s8 = sld [smem:[#allocation3 + $0x5]] }
  0x44   : > { %s1665_s9 = sld [smem:[#allocation3 + $0x29]]  ;;  %s1666_s10 = sld [smem:[#allocation3 + $0x4d]] }
  0x45   : > { %216 = vrot.lane.b32.xlu0 %v211_v3, %s1938_s20  ;;  %230 = vrot.lane.b32.xlu1 %v1643_v4, %s1938_s20  ;;  %v348_v30 = vstv %s1656_s29  ;;  %s1670_s11 = sld [smem:[#allocation3 + $0x7]]  ;;  %s1671_s17 = sld [smem:[#allocation3 + $0x2b]] }
  0x46   : > { %s1672_s19 = sld [smem:[#allocation3 + $0x4f]]  ;;  %s1674_s24 = sld [smem:[#allocation3 + $0x2c]] }
  0x47   : > { %v362_v33 = vstv %s1657_s30  ;;  %v396_v37 = vstv %s1661_s4  ;;  %s1675_s25 = sld [smem:[#allocation3 + $0x50]]  ;;  %s1679_s26 = sld [smem:[#allocation3 + $0xa]] }
  0x48   : > { %v410_v40 = vstv %s1662_s6  ;;  %s1680_s27 = sld [smem:[#allocation3 + $0x2e]]  ;;  %s1681_s29 = sld [smem:[#allocation3 + $0x52]] }
  0x49   : > { %242 = vrot.lane.b32.xlu0 %v1644_v5, %s1938_s20  ;;  %244 = vrot.lane.b32.xlu1 %v1645_v6, %s1938_s20  ;;  %v424_v44 = vstv %s1663_s7  ;;  %v438_v47 = vstv %s1664_s8  ;;  %s1682_s30 = sld [smem:[#allocation3 + $0xb]]  ;;  %s1683_s4 = sld [smem:[#allocation3 + $0x2f]] }
  0x4a   : > { %v452_v50 = vstv %s1665_s9  ;;  %v466_v53 = vstv %s1666_s10  ;;  %s1684_s6 = sld [smem:[#allocation3 + $0x53]]  ;;  %s1688_s7 = sld [smem:[#allocation3 + $0xd]] }
  0x4b   : > { %v500_v57 = vstv %s1670_s11  ;;  %v514_v60 = vstv %s1671_s17  ;;  %s1689_s8 = sld [smem:[#allocation3 + $0x31]]  ;;  %s1690_s9 = sld [smem:[#allocation3 + $0x55]] }
  0x4c   : > { %v528_v0 = vstv %s1672_s19  ;;  %v556_v6 = vstv %s1674_s24  ;;  %s1691_s10 = sld [smem:[#allocation3 + $0xe]]  ;;  %s1692_s11 = sld [smem:[#allocation3 + $0x32]] }
  0x4d   : > { %256 = vrot.lane.b32.xlu0 %v1646_v7, %s1938_s20  ;;  %258 = vrot.lane.b32.xlu1 %v1647_v8, %s1938_s20  ;;  %s1673_s20 = sld [smem:[#allocation3 + $0x8]]  ;;  %s2186_s17 = sld [smem:[#allocation3 + $0x56]] }
  0x4e   : > { %s2192_s19 = sld [smem:[#allocation3 + $0x10]]  ;;  %s2201_s24 = sld [smem:[#allocation3 + $0x34]] }
  0x4f   : > { %p2804_p12 = scmp.ne.s32.totalorder %s2795_s22, 0 }
  0x53   : > { %v542_v3 = vstv %s1673_s20  ;;  %s2196_s20 = sld [smem:[#allocation3]] }
  0xb3   : > { %v215_v9 = vpop.permute.xlu0 %214  ;;  %v229_v10 = vpop.permute.xlu1 %228 }
  0xb4   : > { %221 = vst.msk [vmem:[#allocation2 + $0x1] sm:$0xff] %vm220_vm2, %v215_v9  ;;  %235 = vst.msk [vmem:[#allocation2 + $0x19] sm:$0xff] %vm220_vm2, %v229_v10  ;;  %v570_v9 = vstv %s1675_s25  ;;  %s2205_s25 = sld [smem:[#allocation6]] }
  0xb7   : > { %v217_v11 = vpop.permute.xlu0 %216  ;;  %v231_v12 = vpop.permute.xlu1 %230 }
  0xb8   : > { %222 = vst.msk [vmem:[#allocation2 + $0x9] sm:$0xff] %vm220_vm2, %v217_v11  ;;  %236 = vst.msk [vmem:[#allocation2 + $0x21] sm:$0xff] %vm220_vm2, %v231_v12  ;;  %v604_v11 = vstv %s1679_s26  ;;  %s2207_s26 = sld [smem:[#allocation3 + $0x24]] }
  0xbb   : > { %v2058_v14 = vld [vmem:[#allocation2] sm:$0xff]  ;;  %v243_v15 = vpop.permute.xlu0 %242  ;;  %v245_v16 = vpop.permute.xlu1 %244  ;;  %v2140_v10 = vld [vmem:[#allocation2 + $0x18] sm:$0xff] }
  0xbc   : > { %v293_v17 = vmul.f32 %v292_v13, %v2058_v14  ;;  %249 = vst.msk [vmem:[#allocation2 + $0x31] sm:$0xff] %vm220_vm2, %v243_v15  ;;  %250 = vst.msk [vmem:[#allocation2 + $0x39] sm:$0xff] %vm220_vm2, %v245_v16  ;;  %v307_v22 = vmul.f32 %v306_v18, %v2058_v14  ;;  %v321_v25 = vmul.f32 %v320_v24, %v2058_v14  ;;  %v2086_v36 = vld [vmem:[#allocation2 + $0x1] sm:$0xff] }
  0xbd   : > { %v335_v28 = vmul.f32 %v334_v27, %v2058_v14  ;;  %v349_v31 = vmul.f32 %v348_v30, %v2058_v14  ;;  %v363_v34 = vmul.f32 %v362_v33, %v2058_v14  ;;  %v397_v38 = vmul.f32 %v396_v37, %v2086_v36 }
  0xbe   : > { %297 = vrot.lane.b32.xlu0 %v293_v17, %s1939_s28  ;;  %v411_v42 = vmul.f32 %v410_v40, %v2086_v36  ;;  %v425_v45 = vmul.f32 %v424_v44, %v2086_v36  ;;  %v439_v48 = vmul.f32 %v438_v47, %v2086_v36  ;;  %v453_v51 = vmul.f32 %v452_v50, %v2086_v36 }
  0xbf   : > { %v2064_v19 = vld [vmem:[#allocation2 + $0x8] sm:$0xff]  ;;  %v257_v20 = vpop.permute.xlu0 %256  ;;  %v259_v21 = vpop.permute.xlu1 %258  ;;  %v467_v54 = vmul.f32 %v466_v53, %v2086_v36  ;;  %v605_v15 = vmul.f32 %v604_v11, %v2140_v10  ;;  %v618_v17 = vstv %s1680_s27  ;;  %s2211_s27 = sld [smem:[#allocation3 + $0x48]] }
  0xc0   : > { %v294_v23 = vmul.f32 %v292_v13, %v2064_v19  ;;  %263 = vst.msk [vmem:[#allocation2 + $0x49] sm:$0xff] %vm220_vm2, %v257_v20  ;;  %264 = vst.msk [vmem:[#allocation2 + $0x51] sm:$0xff] %vm220_vm2, %v259_v21  ;;  %v308_v26 = vmul.f32 %v306_v18, %v2064_v19  ;;  %v322_v29 = vmul.f32 %v320_v24, %v2064_v19  ;;  %v2092_v41 = vld [vmem:[#allocation2 + $0x9] sm:$0xff]  ;;  %v2148_v18 = vld [vmem:[#allocation2 + $0x20] sm:$0xff] }
  0xc1   : > { %v336_v32 = vmul.f32 %v334_v27, %v2064_v19  ;;  %v350_v35 = vmul.f32 %v348_v30, %v2064_v19  ;;  %v364_v39 = vmul.f32 %v362_v33, %v2064_v19  ;;  %v398_v43 = vmul.f32 %v396_v37, %v2092_v41  ;;  %v2114_v56 = vld [vmem:[#allocation2 + $0x2] sm:$0xff]  ;;  %v2120_v61 = vld [vmem:[#allocation2 + $0xa] sm:$0xff] }
  0xc2   : > { %311 = vrot.lane.b32.xlu0 %v307_v22, %s1939_s28  ;;  %299 = vrot.lane.b32.xlu1 %v294_v23, %s1939_s28  ;;  %v412_v46 = vmul.f32 %v410_v40, %v2092_v41  ;;  %v426_v49 = vmul.f32 %v424_v44, %v2092_v41  ;;  %v440_v52 = vmul.f32 %v438_v47, %v2092_v41  ;;  %v632_v22 = vstv %s1681_s29  ;;  %v2176_v40 = vld [vmem:[#allocation2 + $0x21] sm:$0xff]  ;;  %s2216_s29 = sld [smem:[#allocation3 + $0x58]] }
  0xc3   : > { %v454_v55 = vmul.f32 %v452_v50, %v2092_v41  ;;  %v501_v58 = vmul.f32 %v500_v57, %v2114_v56  ;;  %v468_v59 = vmul.f32 %v466_v53, %v2092_v41  ;;  %v515_v62 = vmul.f32 %v514_v60, %v2114_v56 }
  0xc4   : > { %v502_v63 = vmul.f32 %v500_v57, %v2120_v61  ;;  %v529_v1 = vmul.f32 %v528_v0, %v2114_v56  ;;  %v516_v2 = vmul.f32 %v514_v60, %v2120_v61  ;;  %v543_v4 = vmul.f32 %v542_v3, %v2114_v56 }
  0xc5   : > { %v530_v5 = vmul.f32 %v528_v0, %v2120_v61  ;;  %v557_v7 = vmul.f32 %v556_v6, %v2114_v56  ;;  %v544_v8 = vmul.f32 %v542_v3, %v2120_v61  ;;  %v571_v12 = vmul.f32 %v570_v9, %v2114_v56 }
  0xc6   : > { %325 = vrot.lane.b32.xlu0 %v321_v25, %s1939_s28  ;;  %313 = vrot.lane.b32.xlu1 %v308_v26, %s1939_s28  ;;  %v558_v13 = vmul.f32 %v556_v6, %v2120_v61  ;;  %v572_v16 = vmul.f32 %v570_v9, %v2120_v61  ;;  %v619_v20 = vmul.f32 %v618_v17, %v2140_v10  ;;  %v646_v25 = vstv %s1682_s30  ;;  %s2221_s30 = sld [smem:[#allocation6 + $0x1]] }
  0xc7   : > { %v606_v21 = vmul.f32 %v604_v11, %v2148_v18  ;;  %v633_v23 = vmul.f32 %v632_v22, %v2140_v10  ;;  %v620_v24 = vmul.f32 %v618_v17, %v2148_v18  ;;  %v647_v26 = vmul.f32 %v646_v25, %v2140_v10 }
  0xc8   : > { %v634_v27 = vmul.f32 %v632_v22, %v2148_v18  ;;  %v648_v30 = vmul.f32 %v646_v25, %v2148_v18  ;;  %v736_v44 = vstv %s1690_s9  ;;  %v750_v47 = vstv %s1691_s10  ;;  %s2241_s9 = sld [smem:[#allocation3 + $0x27]]  ;;  %s2253_s10 = sld [smem:[#allocation3 + $0x4b]] }
  0xc9   : > { %v764_v50 = vstv %s1692_s11  ;;  %v778_v53 = vstv %s2186_s17  ;;  %v274_v60 = vstv %s2196_s20  ;;  %v826_v3 = vstv %s2201_s24  ;;  %s2261_s11 = sld [smem:[#allocation3 + $0x59]]  ;;  %s2275_s17 = sld [smem:[#allocation3 + $0x13]] }
  0xca   : > { %339 = vrot.lane.b32.xlu0 %v335_v28, %s1940_s5  ;;  %327 = vrot.lane.b32.xlu1 %v322_v29, %s1939_s28  ;;  %v660_v28 = vstv %s1683_s4  ;;  %v766_v57 = vmul.f32 %v764_v50, %v2176_v40  ;;  %s2223_s4 = sld [smem:[#allocation3 + $0x3]]  ;;  %v280_v6 = vstv %s2207_s26  ;;  %s2307_s24 = sld [smem:[#allocation3 + $0x6]] }
  0xcb   : > { %v661_v29 = vmul.f32 %v660_v28, %v2140_v10  ;;  %v662_v33 = vmul.f32 %v660_v28, %v2148_v18  ;;  %v840_v17 = vstv %s2216_s29  ;;  %s2303_s20 = sld [smem:[#allocation3 + $0x5b]]  ;;  %s2320_s26 = sld [smem:[#allocation3 + $0x2a]] }
  0xcc   : > { %s2330_s29 = sld [smem:[#allocation3 + $0x4e]] }
  0xce   : > { %353 = vrot.lane.b32.xlu0 %v349_v31, %s1940_s5  ;;  %341 = vrot.lane.b32.xlu1 %v336_v32, %s1940_s5  ;;  %v674_v31 = vstv %s1684_s6  ;;  %s2225_s6 = sld [smem:[#allocation6 + $0x2]] }
  0xcf   : > { %v675_v32 = vmul.f32 %v674_v31, %v2140_v10 }
  0xd2   : > { %367 = vrot.lane.b32.xlu0 %v363_v34, %s1940_s5  ;;  %355 = vrot.lane.b32.xlu1 %v350_v35, %s1940_s5  ;;  %v2170_v34 = vld [vmem:[#allocation2 + $0x19] sm:$0xff]  ;;  %v708_v35 = vstv %s1688_s7  ;;  %s2229_s7 = sld [smem:[#allocation3 + $0x11]] }
  0xd3   : > { %v709_v37 = vmul.f32 %v708_v35, %v2170_v34 }
  0xd6   : > { %401 = vrot.lane.b32.xlu0 %v397_v38, %s1939_s28  ;;  %369 = vrot.lane.b32.xlu1 %v364_v39, %s1940_s5  ;;  %v676_v38 = vmul.f32 %v674_v31, %v2148_v18  ;;  %v722_v39 = vstv %s1689_s8  ;;  %s2239_s8 = sld [smem:[#allocation3 + $0x35]] }
  0xda   : > { %415 = vrot.lane.b32.xlu0 %v411_v42, %s1939_s28  ;;  %403 = vrot.lane.b32.xlu1 %v398_v43, %s1939_s28  ;;  %v723_v42 = vmul.f32 %v722_v39, %v2170_v34  ;;  %v710_v43 = vmul.f32 %v708_v35, %v2176_v40 }
  0xde   : > { %429 = vrot.lane.b32.xlu0 %v425_v45, %s1939_s28  ;;  %417 = vrot.lane.b32.xlu1 %v412_v46, %s1939_s28  ;;  %v737_v45 = vmul.f32 %v736_v44, %v2170_v34  ;;  %v724_v46 = vmul.f32 %v722_v39, %v2176_v40 }
  0xe2   : > { %443 = vrot.lane.b32.xlu0 %v439_v48, %s1940_s5  ;;  %431 = vrot.lane.b32.xlu1 %v426_v49, %s1939_s28  ;;  %v751_v48 = vmul.f32 %v750_v47, %v2170_v34  ;;  %v738_v49 = vmul.f32 %v736_v44, %v2176_v40 }
  0xe6   : > { %457 = vrot.lane.b32.xlu0 %v453_v51, %s1940_s5  ;;  %445 = vrot.lane.b32.xlu1 %v440_v52, %s1940_s5  ;;  %v765_v51 = vmul.f32 %v764_v50, %v2170_v34  ;;  %v752_v52 = vmul.f32 %v750_v47, %v2176_v40 }
  0xea   : > { %471 = vrot.lane.b32.xlu0 %v467_v54, %s1940_s5  ;;  %459 = vrot.lane.b32.xlu1 %v454_v55, %s1940_s5  ;;  %v779_v55 = vmul.f32 %v778_v53, %v2170_v34 }
  0xee   : > { %505 = vrot.lane.b32.xlu0 %v501_v58, %s1939_s28  ;;  %473 = vrot.lane.b32.xlu1 %v468_v59, %s1940_s5  ;;  %v2213_v58 = vld [vmem:[#allocation2 + $0x1a] sm:$0xff]  ;;  %v812_v59 = vstv %s2192_s19  ;;  %s2289_s19 = sld [smem:[#allocation3 + $0x37]] }
  0xef   : > { %v813_v0 = vmul.f32 %v812_v59, %v2213_v58  ;;  %v827_v11 = vmul.f32 %v826_v3, %v2213_v58  ;;  %v841_v28 = vmul.f32 %v840_v17, %v2213_v58 }
  0xf2   : > { %519 = vrot.lane.b32.xlu0 %v515_v62, %s1939_s28  ;;  %507 = vrot.lane.b32.xlu1 %v502_v63, %s1939_s28 }
  0xf6   : > { %533 = vrot.lane.b32.xlu0 %v529_v1, %s1939_s28  ;;  %521 = vrot.lane.b32.xlu1 %v516_v2, %s1939_s28  ;;  %v780_v1 = vmul.f32 %v778_v53, %v2176_v40  ;;  %v275_v2 = vmul.f32 %v274_v60, %v2058_v14 }
  0xfa   : > { %547 = vrot.lane.b32.xlu0 %v543_v4, %s1940_s5  ;;  %535 = vrot.lane.b32.xlu1 %v530_v5, %s1939_s28  ;;  %v2233_v4 = vld [vmem:[#allocation2 + $0x22] sm:$0xff]  ;;  %v266_v5 = vstv %s2205_s25  ;;  %s2316_s25 = sld [smem:[#allocation3 + $0x14]] }
  0xfe   : > { %561 = vrot.lane.b32.xlu0 %v557_v7, %s1940_s5  ;;  %549 = vrot.lane.b32.xlu1 %v544_v8, %s1940_s5  ;;  %v286_v8 = vstv %s2211_s27  ;;  %s2324_s27 = sld [smem:[#allocation3 + $0x38]] }
  0xff   : > { %v287_v25 = vmul.f32 %v286_v8, %v2058_v14 }
 0x102   : > { %575 = vrot.lane.b32.xlu0 %v571_v12, %s1940_s5  ;;  %563 = vrot.lane.b32.xlu1 %v558_v13, %s1940_s5  ;;  %v814_v12 = vmul.f32 %v812_v59, %v2233_v4  ;;  %v277_v13 = vadd.f32 %v275_v2, %v266_v5  ;;  %v882_v2 = vstv %s2261_s11  ;;  %s2399_s11 = sld [smem:[#allocation3 + $0x3b]] }
 0x106   : > { %609 = vrot.lane.b32.xlu0 %v605_v15, %s1939_s28  ;;  %577 = vrot.lane.b32.xlu1 %v572_v16, %s1940_s5  ;;  %v276_v15 = vmul.f32 %v274_v60, %v2064_v19  ;;  %v281_v16 = vmul.f32 %v280_v6, %v2058_v14  ;;  %v384_v14 = vstv %s2241_s9  ;;  %s2391_s9 = sld [smem:[#allocation3 + $0x17]] }
 0x107   : > { %v385_v53 = vmul.f32 %v384_v14, %v2086_v36 }
 0x108   : > { %v278_v31 = vadd.f32 %v276_v15, %v266_v5  ;;  %v883_v15 = vmul.f32 %v882_v2, %v2213_v58 }
 0x10a   : > { %623 = vrot.lane.b32.xlu0 %v619_v20, %s1939_s28  ;;  %611 = vrot.lane.b32.xlu1 %v606_v21, %s1939_s28  ;;  %v268_v20 = vstv %s2221_s30  ;;  %v378_v21 = vstv %s2223_s4  ;;  %s2335_s30 = sld [smem:[#allocation3 + $0x5c]]  ;;  %s2351_s4 = sld [smem:[#allocation3 + $0x16]] }
 0x10b   : > { %v379_v35 = vmul.f32 %v378_v21, %v2086_v36 }
 0x10e   : > { %637 = vrot.lane.b32.xlu0 %v633_v23, %s1939_s28  ;;  %625 = vrot.lane.b32.xlu1 %v620_v24, %s1939_s28  ;;  %v282_v23 = vmul.f32 %v280_v6, %v2064_v19  ;;  %v270_v24 = vstv %s2225_s6  ;;  %v386_v6 = vmul.f32 %v384_v14, %v2092_v41  ;;  %s2363_s6 = sld [smem:[#allocation3 + $0x3a]] }
 0x10f   : > { %v289_v44 = vadd.f32 %v287_v25, %v270_v24  ;;  %v884_v25 = vmul.f32 %v882_v2, %v2233_v4 }
 0x112   : > { %651 = vrot.lane.b32.xlu0 %v647_v26, %s1940_s5  ;;  %639 = vrot.lane.b32.xlu1 %v634_v27, %s1939_s28 }
 0x116   : > { %665 = vrot.lane.b32.xlu0 %v661_v29, %s1940_s5  ;;  %653 = vrot.lane.b32.xlu1 %v648_v30, %s1940_s5  ;;  %v828_v29 = vmul.f32 %v826_v3, %v2233_v4  ;;  %v854_v30 = vstv %s2229_s7  ;;  %s2378_s7 = sld [smem:[#allocation3 + $0x5e]] }
 0x11a   : > { %679 = vrot.lane.b32.xlu0 %v675_v32, %s1940_s5  ;;  %667 = vrot.lane.b32.xlu1 %v662_v33, %s1940_s5  ;;  %v283_v32 = vadd.f32 %v281_v16, %v268_v20 }
 0x11e   : > { %713 = vrot.lane.b32.xlu0 %v709_v37, %s1939_s28  ;;  %681 = vrot.lane.b32.xlu1 %v676_v38, %s1940_s5  ;;  %v868_v37 = vstv %s2239_s8  ;;  %s2382_s8 = sld [smem:[#allocation3 + $0x9]] }
 0x11f   : > { %v870_v16 = vmul.f32 %v868_v37, %v2233_v4 }
 0x122   : > { %727 = vrot.lane.b32.xlu0 %v723_v42, %s1939_s28  ;;  %715 = vrot.lane.b32.xlu1 %v710_v43, %s1939_s28  ;;  %v284_v42 = vadd.f32 %v282_v23, %v268_v20  ;;  %v916_v20 = vstv %s2275_s17  ;;  %s2405_s17 = sld [smem:[#allocation3 + $0x51]] }
 0x126   : > { %741 = vrot.lane.b32.xlu0 %v737_v45, %s1939_s28  ;;  %729 = vrot.lane.b32.xlu1 %v724_v46, %s1939_s28  ;;  %v288_v45 = vmul.f32 %v286_v8, %v2064_v19  ;;  %v390_v19 = vstv %s2253_s10  ;;  %s2395_s10 = sld [smem:[#allocation3 + $0x2d]] }
 0x128   : > { %v290_v60 = vadd.f32 %v288_v45, %v270_v24 }
 0x12a   : > { %755 = vrot.lane.b32.xlu0 %v751_v48, %s1940_s5  ;;  %743 = vrot.lane.b32.xlu1 %v738_v49, %s1939_s28  ;;  %v855_v48 = vmul.f32 %v854_v30, %v2213_v58  ;;  %v842_v49 = vmul.f32 %v840_v17, %v2233_v4 }
 0x12e   : > { %769 = vrot.lane.b32.xlu0 %v765_v51, %s1940_s5  ;;  %757 = vrot.lane.b32.xlu1 %v752_v52, %s1940_s5  ;;  %v380_v52 = vmul.f32 %v378_v21, %v2092_v41  ;;  %v392_v21 = vmul.f32 %v390_v19, %v2092_v41  ;;  %v930_v41 = vstv %s2289_s19  ;;  %s2410_s19 = sld [smem:[#allocation3 + $0x5f]] }
 0x130   : > { %v298_v54 = vpop.permute.xlu0 %297 }
 0x131   : > { %v303_v22 = vadd.f32 %v298_v54, %v277_v13 }
 0x132   : > { %783 = vrot.lane.b32.xlu0 %v779_v55, %s1940_s5  ;;  %771 = vrot.lane.b32.xlu1 %v766_v57, %s1940_s5 }
 0x134   : > { %v300_v62 = vpop.permute.xlu1 %299  ;;  %v312_v63 = vpop.permute.xlu0 %311 }
 0x135   : > { %v304_v38 = vadd.f32 %v300_v62, %v278_v31  ;;  %v317_v39 = vadd.f32 %v312_v63, %v283_v32  ;;  %v944_v32 = vstv %s2303_s20  ;;  %s2424_s20 = sld [smem:[#allocation3 + $0x19]] }
 0x136   : > { %817 = vrot.lane.b32.xlu0 %v813_v0, %s1939_s28  ;;  %785 = vrot.lane.b32.xlu1 %v780_v1, %s1940_s5  ;;  %v869_v0 = vmul.f32 %v868_v37, %v2213_v58  ;;  %v856_v1 = vmul.f32 %v854_v30, %v2233_v4 }
 0x138   : > { %v314_v7 = vpop.permute.xlu1 %313  ;;  %v326_v9 = vpop.permute.xlu0 %325 }
 0x139   : > { %v318_v54 = vadd.f32 %v314_v7, %v284_v42  ;;  %v331_v55 = vadd.f32 %v326_v9, %v289_v44  ;;  %v391_v7 = vmul.f32 %v390_v19, %v2086_v36  ;;  %v2299_v36 = vld [vmem:[#allocation2 + $0x30] sm:$0xff]  ;;  %v958_v44 = vstv %s2316_s25  ;;  %s2451_s25 = sld [smem:[#allocation3 + $0x61]] }
 0x13a   : > { %831 = vrot.lane.b32.xlu0 %v827_v11, %s1939_s28  ;;  %819 = vrot.lane.b32.xlu1 %v814_v12, %s1939_s28  ;;  %v931_v31 = vmul.f32 %v930_v41, %v2299_v36 }
 0x13c   : > { %v328_v26 = vpop.permute.xlu1 %327  ;;  %v340_v27 = vpop.permute.xlu0 %339 }
 0x13d   : > { %v345_v33 = vadd.f32 %v340_v27, %v303_v22  ;;  %v332_v8 = vadd.f32 %v328_v26, %v290_v60  ;;  %v917_v26 = vmul.f32 %v916_v20, %v2299_v36  ;;  %v2313_v27 = vld [vmem:[#allocation2 + $0x38] sm:$0xff] }
 0x13e   : > { %845 = vrot.lane.b32.xlu0 %v841_v28, %s1939_s28  ;;  %833 = vrot.lane.b32.xlu1 %v828_v29, %s1939_s28  ;;  %v918_v30 = vmul.f32 %v916_v20, %v2313_v27 }
 0x13f   : > { %v2268_v43 = vadd.f32 %v379_v35, %v345_v33  ;;  %v482_v33 = vstv %s2307_s24  ;;  %s2436_s24 = sld [smem:[#allocation3 + $0x3d]] }
 0x140   : > { %v342_v46 = vpop.permute.xlu1 %341  ;;  %v354_v47 = vpop.permute.xlu0 %353  ;;  %v483_v45 = vmul.f32 %v482_v33, %v2114_v56 }
 0x141   : > { %v346_v50 = vadd.f32 %v342_v46, %v304_v38  ;;  %v359_v51 = vadd.f32 %v354_v47, %v317_v39  ;;  %v932_v38 = vmul.f32 %v930_v41, %v2313_v27  ;;  %v945_v39 = vmul.f32 %v944_v32, %v2299_v36 }
 0x142   : > { %859 = vrot.lane.b32.xlu0 %v855_v48, %s1940_s5  ;;  %847 = vrot.lane.b32.xlu1 %v842_v49, %s1939_s28  ;;  %v488_v46 = vstv %s2320_s26  ;;  %s2455_s26 = sld [smem:[#allocation3 + $0xc]] }
 0x143   : > { %v2280_v57 = vadd.f32 %v380_v52, %v346_v50  ;;  %v2282_v59 = vadd.f32 %v385_v53, %v359_v51  ;;  %v946_v51 = vmul.f32 %v944_v32, %v2313_v27  ;;  %v959_v52 = vmul.f32 %v958_v44, %v2299_v36 }
 0x144   : > { %v356_v62 = vpop.permute.xlu1 %355  ;;  %v368_v63 = vpop.permute.xlu0 %367  ;;  %v972_v53 = vstv %s2324_s27  ;;  %v489_v60 = vmul.f32 %v488_v46, %v2114_v56  ;;  %s2464_s27 = sld [smem:[#allocation3 + $0x1a]] }
 0x145   : > { %v360_v3 = vadd.f32 %v356_v62, %v318_v54  ;;  %v373_v5 = vadd.f32 %v368_v63, %v331_v55  ;;  %v484_v55 = vmul.f32 %v482_v33, %v2120_v61  ;;  %v974_v20 = vmul.f32 %v972_v53, %v2313_v27 }
 0x146   : > { %873 = vrot.lane.b32.xlu0 %v869_v0, %s1940_s5  ;;  %861 = vrot.lane.b32.xlu1 %v856_v1, %s1940_s5 }
 0x147   : > { %v2293_v9 = vadd.f32 %v386_v6, %v360_v3  ;;  %v2295_v11 = vadd.f32 %v391_v7, %v373_v5  ;;  %v960_v3 = vmul.f32 %v958_v44, %v2313_v27  ;;  %v973_v5 = vmul.f32 %v972_v53, %v2299_v36 }
 0x148   : > { %v370_v12 = vpop.permute.xlu1 %369  ;;  %v402_v13 = vpop.permute.xlu0 %401  ;;  %v986_v6 = vstv %s2335_s30  ;;  %s2472_s30 = sld [smem:[#allocation3 + $0x3e]] }
 0x149   : > { %v374_v17 = vadd.f32 %v370_v12, %v332_v8  ;;  %v407_v35 = vadd.f32 %v402_v13, %v2268_v43  ;;  %v490_v12 = vmul.f32 %v488_v46, %v2120_v61 }
 0x14a   : > { %887 = vrot.lane.b32.xlu0 %v883_v15, %s1940_s5  ;;  %875 = vrot.lane.b32.xlu1 %v870_v16, %s1940_s5 }
 0x14b   : > { %v2309_v22 = vadd.f32 %v392_v21, %v374_v17  ;;  %v987_v21 = vmul.f32 %v986_v6, %v2299_v36 }
 0x14c   : > { %v404_v23 = vpop.permute.xlu1 %403  ;;  %v416_v24 = vpop.permute.xlu0 %415 }
 0x14d   : > { %v408_v43 = vadd.f32 %v404_v23, %v2280_v57  ;;  %v421_v47 = vadd.f32 %v416_v24, %v2282_v59  ;;  %v494_v57 = vstv %s2330_s29  ;;  %v2374_v23 = vld [vmem:[#allocation2 + $0x31] sm:$0xff]  ;;  %v1020_v24 = vstv %s2351_s4  ;;  %s2468_s29 = sld [smem:[#allocation3 + $0x30]]  ;;  %s2478_s4 = sld [smem:[#allocation3 + $0x54]] }
 0x14e   : > { %889 = vrot.lane.b32.xlu1 %v884_v25, %s1940_s5  ;;  %921 = vrot.lane.b32.xlu0 %v917_v26, %s1939_s28  ;;  %v495_v13 = vmul.f32 %v494_v57, %v2114_v56  ;;  %v496_v25 = vmul.f32 %v494_v57, %v2120_v61  ;;  %v1034_v61 = vstv %s2363_s6  ;;  %s2483_s6 = sld [smem:[#allocation3 + $0x62]] }
 0x150   : > { %v418_v28 = vpop.permute.xlu1 %417  ;;  %v430_v29 = vpop.permute.xlu0 %429 }
 0x151   : > { %v422_v59 = vadd.f32 %v418_v28, %v2293_v9  ;;  %v435_v62 = vadd.f32 %v430_v29, %v2295_v11  ;;  %v988_v28 = vmul.f32 %v986_v6, %v2313_v27  ;;  %v1021_v29 = vmul.f32 %v1020_v24, %v2374_v23 }
 0x152   : > { %923 = vrot.lane.b32.xlu1 %v918_v30, %s1939_s28  ;;  %935 = vrot.lane.b32.xlu0 %v931_v31, %s1939_s28  ;;  %v2388_v30 = vld [vmem:[#allocation2 + $0x39] sm:$0xff] }
 0x153   : > { %v1022_v33 = vmul.f32 %v1020_v24, %v2388_v30  ;;  %v1036_v44 = vmul.f32 %v1034_v61, %v2388_v30 }
 0x154   : > { %v432_v37 = vpop.permute.xlu1 %431  ;;  %v444_v14 = vpop.permute.xlu0 %443 }
 0x155   : > { %v449_v42 = vadd.f32 %v444_v14, %v407_v35  ;;  %v436_v9 = vadd.f32 %v432_v37, %v2309_v22  ;;  %v1035_v35 = vmul.f32 %v1034_v61, %v2374_v23  ;;  %v1048_v37 = vstv %s2378_s7  ;;  %s2495_s7 = sld [smem:[#allocation3 + $0x1c]] }
 0x156   : > { %937 = vrot.lane.b32.xlu1 %v932_v38, %s1939_s28  ;;  %949 = vrot.lane.b32.xlu0 %v945_v39, %s1939_s28  ;;  %v586_v14 = vstv %s2382_s8  ;;  %s2507_s8 = sld [smem:[#allocation3 + $0x40]] }
 0x157   : > { %v2344_v48 = vadd.f32 %v483_v45, %v449_v42  ;;  %v1049_v45 = vmul.f32 %v1048_v37, %v2374_v23 }
 0x158   : > { %v446_v49 = vpop.permute.xlu1 %445  ;;  %v458_v50 = vpop.permute.xlu0 %457 }
 0x159   : > { %v450_v19 = vadd.f32 %v446_v49, %v408_v43  ;;  %v463_v54 = vadd.f32 %v458_v50, %v421_v47  ;;  %v1062_v43 = vstv %s2391_s9  ;;  %v587_v47 = vmul.f32 %v586_v14, %v2140_v10  ;;  %s2518_s9 = sld [smem:[#allocation3 + $0x64]] }
 0x15a   : > { %951 = vrot.lane.b32.xlu1 %v946_v51, %s1939_s28  ;;  %963 = vrot.lane.b32.xlu0 %v959_v52, %s1940_s5  ;;  %v592_v49 = vstv %s2395_s10  ;;  %s2522_s10 = sld [smem:[#allocation3 + $0xf]] }
 0x15b   : > { %v486_v63 = vadd.f32 %v484_v55, %v450_v19  ;;  %v491_v0 = vadd.f32 %v489_v60, %v463_v54  ;;  %v1050_v19 = vmul.f32 %v1048_v37, %v2388_v30  ;;  %v1063_v54 = vmul.f32 %v1062_v43, %v2374_v23 }
 0x15c   : > { %v460_v1 = vpop.permute.xlu1 %459  ;;  %v472_v2 = vpop.permute.xlu0 %471  ;;  %v1076_v55 = vstv %s2399_s11  ;;  %s2529_s11 = sld [smem:[#allocation3 + $0x1d]] }
 0x15d   : > { %v464_v7 = vadd.f32 %v460_v1, %v422_v59  ;;  %v477_v8 = vadd.f32 %v472_v2, %v435_v62  ;;  %v588_v59 = vmul.f32 %v586_v14, %v2148_v18  ;;  %v593_v62 = vmul.f32 %v592_v49, %v2140_v10 }
 0x15e   : > { %965 = vrot.lane.b32.xlu1 %v960_v3, %s1940_s5  ;;  %977 = vrot.lane.b32.xlu0 %v973_v5, %s1940_s5  ;;  %v1078_v24 = vmul.f32 %v1076_v55, %v2388_v30 }
 0x15f   : > { %v2368_v11 = vadd.f32 %v490_v12, %v464_v7  ;;  %v2370_v15 = vadd.f32 %v495_v13, %v477_v8  ;;  %v1064_v7 = vmul.f32 %v1062_v43, %v2388_v30  ;;  %v1077_v8 = vmul.f32 %v1076_v55, %v2374_v23 }
 0x160   : > { %v474_v16 = vpop.permute.xlu1 %473  ;;  %v506_v17 = vpop.permute.xlu0 %505  ;;  %v1090_v12 = vstv %s2410_s19  ;;  %s2537_s19 = sld [smem:[#allocation3 + $0x41]] }
 0x161   : > { %v478_v56 = vadd.f32 %v474_v16, %v436_v9  ;;  %v511_v38 = vadd.f32 %v506_v17, %v2344_v48  ;;  %v594_v16 = vmul.f32 %v592_v49, %v2148_v18 }
 0x162   : > { %979 = vrot.lane.b32.xlu1 %v974_v20, %s1940_s5  ;;  %991 = vrot.lane.b32.xlu0 %v987_v21, %s1940_s5 }
 0x163   : > { %v2384_v22 = vadd.f32 %v496_v25, %v478_v56  ;;  %v1091_v25 = vmul.f32 %v1090_v12, %v2374_v23 }
 0x164   : > { %v508_v26 = vpop.permute.xlu1 %507  ;;  %v520_v41 = vpop.permute.xlu0 %519 }
 0x165   : > { %v512_v48 = vadd.f32 %v508_v26, %v486_v63  ;;  %v525_v50 = vadd.f32 %v520_v41, %v491_v0  ;;  %v598_v63 = vstv %s2405_s17  ;;  %v2447_v26 = vld [vmem:[#allocation2 + $0x32] sm:$0xff]  ;;  %v1124_v41 = vstv %s2424_s20  ;;  %s2533_s17 = sld [smem:[#allocation3 + $0x33]]  ;;  %s2543_s20 = sld [smem:[#allocation3 + $0x57]] }
 0x166   : > { %993 = vrot.lane.b32.xlu1 %v988_v28, %s1940_s5  ;;  %1025 = vrot.lane.b32.xlu0 %v1021_v29, %s1939_s28  ;;  %v599_v17 = vmul.f32 %v598_v63, %v2140_v10  ;;  %v600_v28 = vmul.f32 %v598_v63, %v2148_v18  ;;  %v1138_v18 = vstv %s2436_s24  ;;  %s2547_s24 = sld [smem:[#allocation3 + $0x65]] }
 0x168   : > { %v522_v31 = vpop.permute.xlu1 %521  ;;  %v534_v32 = vpop.permute.xlu0 %533 }
 0x169   : > { %v526_v0 = vadd.f32 %v522_v31, %v2368_v11  ;;  %v539_v1 = vadd.f32 %v534_v32, %v2370_v15  ;;  %v1092_v31 = vmul.f32 %v1090_v12, %v2388_v30  ;;  %v1125_v32 = vmul.f32 %v1124_v41, %v2447_v26 }
 0x16a   : > { %1027 = vrot.lane.b32.xlu1 %v1022_v33, %s1939_s28  ;;  %1039 = vrot.lane.b32.xlu0 %v1035_v35, %s1939_s28  ;;  %v2461_v33 = vld [vmem:[#allocation2 + $0x3a] sm:$0xff] }
 0x16b   : > { %v1126_v14 = vmul.f32 %v1124_v41, %v2461_v33  ;;  %v1140_v43 = vmul.f32 %v1138_v18, %v2461_v33 }
 0x16c   : > { %v536_v39 = vpop.permute.xlu1 %535  ;;  %v548_v42 = vpop.permute.xlu0 %547 }
 0x16d   : > { %v553_v46 = vadd.f32 %v548_v42, %v511_v38  ;;  %v540_v11 = vadd.f32 %v536_v39, %v2384_v22  ;;  %v1139_v38 = vmul.f32 %v1138_v18, %v2447_v26  ;;  %v1152_v39 = vstv %s2451_s25  ;;  %s2559_s25 = sld [smem:[#allocation3 + $0x1f]] }
 0x16e   : > { %1041 = vrot.lane.b32.xlu1 %v1036_v44, %s1939_s28  ;;  %1053 = vrot.lane.b32.xlu0 %v1049_v45, %s1939_s28  ;;  %v690_v42 = vstv %s2455_s26  ;;  %s2569_s26 = sld [smem:[#allocation3 + $0x43]] }
 0x16f   : > { %v2417_v51 = vadd.f32 %v587_v47, %v553_v46  ;;  %v1153_v47 = vmul.f32 %v1152_v39, %v2447_v26 }
 0x170   : > { %v550_v52 = vpop.permute.xlu1 %549  ;;  %v562_v53 = vpop.permute.xlu0 %561 }
 0x171   : > { %v554_v60 = vadd.f32 %v550_v52, %v512_v48  ;;  %v567_v57 = vadd.f32 %v562_v53, %v525_v50  ;;  %v1166_v48 = vstv %s2464_s27  ;;  %v691_v50 = vmul.f32 %v690_v42, %v2170_v34  ;;  %s2579_s27 = sld [smem:[#allocation3 + $0x67]] }
 0x172   : > { %1055 = vrot.lane.b32.xlu1 %v1050_v19, %s1939_s28  ;;  %1067 = vrot.lane.b32.xlu0 %v1063_v54, %s1940_s5  ;;  %v696_v52 = vstv %s2468_s29  ;;  %s2583_s29 = sld [smem:[#allocation3 + $0x12]] }
 0x173   : > { %v590_v2 = vadd.f32 %v588_v59, %v554_v60  ;;  %v595_v3 = vadd.f32 %v593_v62, %v567_v57  ;;  %v1154_v60 = vmul.f32 %v1152_v39, %v2461_v33  ;;  %v1167_v57 = vmul.f32 %v1166_v48, %v2447_v26 }
 0x174   : > { %v564_v5 = vpop.permute.xlu1 %563  ;;  %v576_v6 = vpop.permute.xlu0 %575  ;;  %v1180_v59 = vstv %s2472_s30  ;;  %s2590_s30 = sld [smem:[#allocation3 + $0x20]] }
 0x175   : > { %v568_v13 = vadd.f32 %v564_v5, %v526_v0  ;;  %v581_v9 = vadd.f32 %v576_v6, %v539_v1  ;;  %v692_v0 = vmul.f32 %v690_v42, %v2176_v40  ;;  %v697_v1 = vmul.f32 %v696_v52, %v2170_v34  ;;  %v2526_v42 = vld [vmem:[#allocation2 + $0x50] sm:$0xff] }
 0x176   : > { %1069 = vrot.lane.b32.xlu1 %v1064_v7, %s1940_s5  ;;  %1081 = vrot.lane.b32.xlu0 %v1077_v8, %s1940_s5  ;;  %v1182_v41 = vmul.f32 %v1180_v59, %v2461_v33 }
 0x177   : > { %v2441_v15 = vadd.f32 %v594_v16, %v568_v13  ;;  %v2443_v20 = vadd.f32 %v599_v17, %v581_v9  ;;  %v1168_v13 = vmul.f32 %v1166_v48, %v2461_v33  ;;  %v1181_v9 = vmul.f32 %v1180_v59, %v2447_v26 }
 0x178   : > { %v578_v21 = vpop.permute.xlu1 %577  ;;  %v610_v56 = vpop.permute.xlu0 %609  ;;  %v1194_v16 = vstv %s2483_s6  ;;  %v1256_v48 = vstv %s2518_s9  ;;  %v800_v59 = vstv %s2533_s17  ;;  %s2598_s6 = sld [smem:[#allocation3 + $0x44]]  ;;  %s2620_s9 = sld [smem:[#allocation3 + $0x22]] }
 0x179   : > { %v582_v10 = vadd.f32 %v578_v21, %v540_v11  ;;  %v615_v44 = vadd.f32 %v610_v56, %v2417_v51  ;;  %v698_v21 = vmul.f32 %v696_v52, %v2176_v40  ;;  %s2644_s17 = sld [smem:[#allocation3 + $0x15]] }
 0x17a   : > { %1083 = vrot.lane.b32.xlu1 %v1078_v24, %s1940_s5  ;;  %1095 = vrot.lane.b32.xlu0 %v1091_v25, %s1940_s5 }
 0x17b   : > { %v2457_v22 = vadd.f32 %v600_v28, %v582_v10  ;;  %v1195_v28 = vmul.f32 %v1194_v16, %v2447_v26 }
 0x17c   : > { %v612_v29 = vpop.permute.xlu1 %611  ;;  %v624_v61 = vpop.permute.xlu0 %623 }
 0x17d   : > { %v616_v51 = vadd.f32 %v612_v29, %v590_v2  ;;  %v629_v53 = vadd.f32 %v624_v61, %v595_v3  ;;  %v702_v2 = vstv %s2478_s4  ;;  %s2594_s4 = sld [smem:[#allocation3 + $0x36]] }
 0x17e   : > { %1097 = vrot.lane.b32.xlu1 %v1092_v31, %s1940_s5  ;;  %1129 = vrot.lane.b32.xlu0 %v1125_v32, %s1939_s28  ;;  %v703_v56 = vmul.f32 %v702_v2, %v2170_v34  ;;  %v2514_v34 = vld [vmem:[#allocation2 + $0x48] sm:$0xff]  ;;  %v1228_v31 = vstv %s2495_s7  ;;  %v704_v32 = vmul.f32 %v702_v2, %v2176_v40  ;;  %v1242_v40 = vstv %s2507_s8  ;;  %s2604_s7 = sld [smem:[#allocation3 + $0x5a]]  ;;  %s2608_s8 = sld [smem:[#allocation3 + $0x68]] }
 0x180   : > { %v626_v35 = vpop.permute.xlu1 %625  ;;  %v638_v37 = vpop.permute.xlu0 %637 }
 0x181   : > { %v630_v3 = vadd.f32 %v626_v35, %v2441_v15  ;;  %v643_v5 = vadd.f32 %v638_v37, %v2443_v20  ;;  %v1196_v37 = vmul.f32 %v1194_v16, %v2461_v33 }
 0x182   : > { %1131 = vrot.lane.b32.xlu1 %v1126_v14, %s1939_s28  ;;  %1143 = vrot.lane.b32.xlu0 %v1139_v38, %s1939_s28  ;;  %v1229_v14 = vmul.f32 %v1228_v31, %v2514_v34 }
 0x184   : > { %v640_v45 = vpop.permute.xlu1 %639  ;;  %v652_v46 = vpop.permute.xlu0 %651 }
 0x185   : > { %v657_v49 = vadd.f32 %v652_v46, %v615_v44  ;;  %v644_v15 = vadd.f32 %v640_v45, %v2457_v22  ;;  %v1230_v46 = vmul.f32 %v1228_v31, %v2526_v42 }
 0x186   : > { %1145 = vrot.lane.b32.xlu1 %v1140_v43, %s1939_s28  ;;  %1157 = vrot.lane.b32.xlu0 %v1153_v47, %s1939_s28  ;;  %v1243_v43 = vmul.f32 %v1242_v40, %v2514_v34 }
 0x187   : > { %v693_v19 = vadd.f32 %v691_v50, %v657_v49  ;;  %v794_v50 = vstv %s2522_s10  ;;  %s2630_s10 = sld [smem:[#allocation3 + $0x46]] }
 0x188   : > { %v654_v54 = vpop.permute.xlu1 %653  ;;  %v666_v55 = vpop.permute.xlu0 %665 }
 0x189   : > { %v658_v62 = vadd.f32 %v654_v54, %v616_v51  ;;  %v671_v63 = vadd.f32 %v666_v55, %v629_v53  ;;  %v1244_v53 = vmul.f32 %v1242_v40, %v2526_v42 }
 0x18a   : > { %1159 = vrot.lane.b32.xlu1 %v1154_v60, %s1939_s28  ;;  %1171 = vrot.lane.b32.xlu0 %v1167_v57, %s1940_s5  ;;  %v1270_v60 = vstv %s2529_s11  ;;  %v795_v57 = vmul.f32 %v794_v50, %v2213_v58  ;;  %s2640_s11 = sld [smem:[#allocation3 + $0x6a]] }
 0x18b   : > { %v694_v6 = vadd.f32 %v692_v0, %v658_v62  ;;  %v699_v7 = vadd.f32 %v697_v1, %v671_v63  ;;  %v1258_v1 = vmul.f32 %v1256_v48, %v2526_v42  ;;  %v1271_v2 = vmul.f32 %v1270_v60, %v2514_v34 }
 0x18c   : > { %v668_v8 = vpop.permute.xlu1 %667  ;;  %v680_v12 = vpop.permute.xlu0 %679 }
 0x18d   : > { %v672_v17 = vadd.f32 %v668_v8, %v630_v3  ;;  %v685_v11 = vadd.f32 %v680_v12, %v643_v5  ;;  %v1284_v3 = vstv %s2537_s19  ;;  %v801_v8 = vmul.f32 %v800_v59, %v2213_v58  ;;  %s2651_s19 = sld [smem:[#allocation3 + $0x23]] }
 0x18e   : > { %1173 = vrot.lane.b32.xlu1 %v1168_v13, %s1940_s5  ;;  %1185 = vrot.lane.b32.xlu0 %v1181_v9, %s1940_s5  ;;  %v806_v12 = vstv %s2543_s20  ;;  %s2655_s20 = sld [smem:[#allocation3 + $0x39]] }
 0x18f   : > { %v700_v20 = vadd.f32 %v698_v21, %v672_v17  ;;  %v705_v24 = vadd.f32 %v703_v56, %v685_v11  ;;  %v1272_v11 = vmul.f32 %v1270_v60, %v2526_v42  ;;  %v1285_v21 = vmul.f32 %v1284_v3, %v2514_v34 }
 0x190   : > { %v682_v25 = vpop.permute.xlu1 %681  ;;  %v714_v10 = vpop.permute.xlu0 %713  ;;  %v1298_v56 = vstv %s2547_s24  ;;  %s2659_s24 = sld [smem:[#allocation3 + $0x47]] }
 0x191   : > { %v686_v29 = vadd.f32 %v682_v25, %v644_v15  ;;  %v719_v61 = vadd.f32 %v714_v10, %v693_v19  ;;  %v1257_v19 = vmul.f32 %v1256_v48, %v2514_v34  ;;  %v807_v25 = vmul.f32 %v806_v12, %v2213_v58 }
 0x192   : > { %1187 = vrot.lane.b32.xlu1 %v1182_v41, %s1940_s5  ;;  %1199 = vrot.lane.b32.xlu0 %v1195_v28, %s1940_s5  ;;  %v1299_v31 = vmul.f32 %v1298_v56, %v2514_v34  ;;  %v1332_v58 = vstv %s2559_s25  ;;  %s2665_s25 = sld [smem:[#allocation3 + $0x5d]] }
 0x193   : > { %v706_v22 = vadd.f32 %v704_v32, %v686_v29 }
 0x194   : > { %v716_v18 = vpop.permute.xlu1 %715  ;;  %v728_v35 = vpop.permute.xlu0 %727 }
 0x195   : > { %v720_v38 = vadd.f32 %v716_v18, %v694_v6  ;;  %v733_v39 = vadd.f32 %v728_v35, %v699_v7  ;;  %v796_v7 = vmul.f32 %v794_v50, %v2233_v4  ;;  %v2575_v18 = vld [vmem:[#allocation2 + $0x49] sm:$0xff]  ;;  %v808_v35 = vmul.f32 %v806_v12, %v2233_v4 }
 0x196   : > { %1201 = vrot.lane.b32.xlu1 %v1196_v37, %s1940_s5  ;;  %1233 = vrot.lane.b32.xlu0 %v1229_v14, %s1939_s28  ;;  %v1333_v40 = vmul.f32 %v1332_v58, %v2575_v18 }
 0x198   : > { %v730_v44 = vpop.permute.xlu1 %729  ;;  %v742_v45 = vpop.permute.xlu0 %741 }
 0x199   : > { %v734_v47 = vadd.f32 %v730_v44, %v700_v20  ;;  %v747_v49 = vadd.f32 %v742_v45, %v705_v24  ;;  %v802_v24 = vmul.f32 %v800_v59, %v2233_v4  ;;  %v1346_v4 = vstv %s2569_s26  ;;  %s2669_s26 = sld [smem:[#allocation3 + $0x6b]] }
 0x19a   : > { %1235 = vrot.lane.b32.xlu1 %v1230_v46, %s1939_s28  ;;  %1247 = vrot.lane.b32.xlu0 %v1243_v43, %s1939_s28  ;;  %v2587_v46 = vld [vmem:[#allocation2 + $0x51] sm:$0xff]  ;;  %v1347_v48 = vmul.f32 %v1346_v4, %v2575_v18 }
 0x19c   : > { %v744_v52 = vpop.permute.xlu1 %743  ;;  %v756_v51 = vpop.permute.xlu0 %755 }
 0x19d   : > { %v748_v54 = vadd.f32 %v744_v52, %v706_v22  ;;  %v761_v55 = vadd.f32 %v756_v51, %v719_v61  ;;  %v1286_v61 = vmul.f32 %v1284_v3, %v2526_v42  ;;  %v1360_v51 = vstv %s2579_s27  ;;  %s1722_s27 = sld [smem:[#allocation3 + $0x3c]] }
 0x19e   : > { %1249 = vrot.lane.b32.xlu1 %v1244_v53, %s1939_s28  ;;  %1261 = vrot.lane.b32.xlu0 %v1257_v19, %s1939_s28  ;;  %v898_v53 = vstv %s2583_s29  ;;  %v1361_v60 = vmul.f32 %v1360_v51, %v2575_v18  ;;  %s1723_s29 = sld [smem:[#allocation3 + $0x60]] }
 0x19f   : > { %v797_v62 = vadd.f32 %v795_v57, %v761_v55  ;;  %v1348_v55 = vmul.f32 %v1346_v4, %v2587_v46 }
 0x1a0   : > { %v758_v63 = vpop.permute.xlu1 %757  ;;  %v770_v0 = vpop.permute.xlu0 %769 }
 0x1a1   : > { %v762_v5 = vadd.f32 %v758_v63, %v720_v38  ;;  %v775_v6 = vadd.f32 %v770_v0, %v733_v39  ;;  %v1300_v39 = vmul.f32 %v1298_v56, %v2526_v42  ;;  %v899_v63 = vmul.f32 %v898_v53, %v2299_v36 }
 0x1a2   : > { %1263 = vrot.lane.b32.xlu1 %v1258_v1, %s1939_s28  ;;  %1275 = vrot.lane.b32.xlu0 %v1271_v2, %s1940_s5  ;;  %v904_v0 = vstv %s2594_s4  ;;  %s1732_s4 = sld [smem:[#allocation3 + $0x63]] }
 0x1a3   : > { %v798_v13 = vadd.f32 %v796_v7, %v762_v5  ;;  %v803_v9 = vadd.f32 %v801_v8, %v775_v6  ;;  %v1362_v5 = vmul.f32 %v1360_v51, %v2587_v46  ;;  %v1388_v7 = vstv %s2598_s6  ;;  %s1739_s6 = sld [smem:[#allocation3 + $0x1e]] }
 0x1a4   : > { %v772_v16 = vpop.permute.xlu1 %771  ;;  %v784_v17 = vpop.permute.xlu0 %783 }
 0x1a5   : > { %v776_v15 = vadd.f32 %v772_v16, %v734_v47  ;;  %v789_v20 = vadd.f32 %v784_v17, %v747_v49  ;;  %v1334_v49 = vmul.f32 %v1332_v58, %v2587_v46  ;;  %v910_v16 = vstv %s2604_s7  ;;  %s1740_s7 = sld [smem:[#allocation3 + $0x42]] }
 0x1a6   : > { %1277 = vrot.lane.b32.xlu1 %v1272_v11, %s1940_s5  ;;  %1289 = vrot.lane.b32.xlu0 %v1285_v21, %s1940_s5 }
 0x1a7   : > { %v804_v10 = vadd.f32 %v802_v24, %v776_v15  ;;  %v809_v41 = vadd.f32 %v807_v25, %v789_v20  ;;  %v1389_v20 = vmul.f32 %v1388_v7, %v2575_v18  ;;  %v1402_v24 = vstv %s2608_s8  ;;  %s2710_s8 = sld [smem:[#allocation3 + $0x66]] }
 0x1a8   : > { %v786_v28 = vpop.permute.xlu1 %785  ;;  %v818_v29 = vpop.permute.xlu0 %817  ;;  %v1403_v58 = vmul.f32 %v1402_v24, %v2575_v18 }
 0x1a9   : > { %v790_v32 = vadd.f32 %v786_v28, %v748_v54  ;;  %v823_v22 = vadd.f32 %v818_v29, %v797_v62  ;;  %v1374_v62 = vstv %s2590_s30  ;;  %v911_v28 = vmul.f32 %v910_v16, %v2299_v36  ;;  %s1731_s30 = sld [smem:[#allocation3 + $0x3f]] }
 0x1aa   : > { %1291 = vrot.lane.b32.xlu1 %v1286_v61, %s1940_s5  ;;  %1303 = vrot.lane.b32.xlu0 %v1299_v31, %s1940_s5  ;;  %v1375_v6 = vmul.f32 %v1374_v62, %v2575_v18  ;;  %v1376_v15 = vmul.f32 %v1374_v62, %v2587_v46 }
 0x1ab   : > { %v810_v37 = vadd.f32 %v808_v35, %v790_v32 }
 0x1ac   : > { %v820_v14 = vpop.permute.xlu1 %819  ;;  %v832_v38 = vpop.permute.xlu0 %831 }
 0x1ad   : > { %v824_v44 = vadd.f32 %v820_v14, %v798_v13  ;;  %v837_v45 = vadd.f32 %v832_v38, %v803_v9  ;;  %v900_v13 = vmul.f32 %v898_v53, %v2313_v27  ;;  %v905_v9 = vmul.f32 %v904_v0, %v2299_v36  ;;  %v2636_v14 = vld [vmem:[#allocation2 + $0x4a] sm:$0xff] }
 0x1ae   : > { %1305 = vrot.lane.b32.xlu1 %v1300_v39, %s1940_s5  ;;  %1337 = vrot.lane.b32.xlu0 %v1333_v40, %s1939_s28  ;;  %v1436_v36 = vstv %s2620_s9  ;;  %v912_v38 = vmul.f32 %v910_v16, %v2313_v27  ;;  %s1748_s9 = sld [smem:[#allocation3 + $0x21]] }
 0x1af   : > { %v1437_v4 = vmul.f32 %v1436_v36, %v2636_v14 }
 0x1b0   : > { %v834_v43 = vpop.permute.xlu1 %833  ;;  %v846_v47 = vpop.permute.xlu0 %845 }
 0x1b1   : > { %v838_v50 = vadd.f32 %v834_v43, %v804_v10  ;;  %v851_v52 = vadd.f32 %v846_v47, %v809_v41  ;;  %v906_v41 = vmul.f32 %v904_v0, %v2313_v27  ;;  %v1450_v27 = vstv %s2630_s10  ;;  %s1749_s10 = sld [smem:[#allocation3 + $0x45]] }
 0x1b2   : > { %1339 = vrot.lane.b32.xlu1 %v1334_v49, %s1939_s28  ;;  %1351 = vrot.lane.b32.xlu0 %v1347_v48, %s1939_s28  ;;  %v2648_v49 = vld [vmem:[#allocation2 + $0x52] sm:$0xff]  ;;  %v1451_v51 = vmul.f32 %v1450_v27, %v2636_v14 }
 0x1b4   : > { %v848_v19 = vpop.permute.xlu1 %847  ;;  %v860_v54 = vpop.permute.xlu0 %859 }
 0x1b5   : > { %v852_v57 = vadd.f32 %v848_v19, %v810_v37  ;;  %v865_v59 = vadd.f32 %v860_v54, %v823_v22  ;;  %v1390_v22 = vmul.f32 %v1388_v7, %v2587_v46  ;;  %v1464_v54 = vstv %s2640_s11  ;;  %s2719_s11 = sld [smem:[#allocation3 + $0x69]] }
 0x1b6   : > { %1353 = vrot.lane.b32.xlu1 %v1348_v55, %s1939_s28  ;;  %1365 = vrot.lane.b32.xlu0 %v1361_v60, %s1939_s28  ;;  %v1002_v55 = vstv %s2644_s17  ;;  %v1465_v62 = vmul.f32 %v1464_v54, %v2636_v14  ;;  %s188_s17 = sand.u32 1, %s1925_s13  }
 0x1b7   : > { %v901_v1 = vadd.f32 %v899_v63, %v865_v59  ;;  %v1452_v59 = vmul.f32 %v1450_v27, %v2648_v49 }
 0x1b8   : > { %v862_v2 = vpop.permute.xlu1 %861  ;;  %v874_v3 = vpop.permute.xlu0 %873 }
 0x1b9   : > { %v866_v8 = vadd.f32 %v862_v2, %v824_v44  ;;  %v879_v12 = vadd.f32 %v874_v3, %v837_v45  ;;  %v1404_v45 = vmul.f32 %v1402_v24, %v2587_v46  ;;  %v1003_v2 = vmul.f32 %v1002_v55, %v2374_v23 }
 0x1ba   : > { %1367 = vrot.lane.b32.xlu1 %v1362_v5, %s1939_s28  ;;  %1379 = vrot.lane.b32.xlu0 %v1375_v6, %s1940_s5  ;;  %v1008_v3 = vstv %s2655_s20 }
 0x1bb   : > { %v902_v17 = vadd.f32 %v900_v13, %v866_v8  ;;  %v907_v11 = vadd.f32 %v905_v9, %v879_v12  ;;  %v1466_v8 = vmul.f32 %v1464_v54, %v2648_v49  ;;  %v1492_v13 = vstv %s2659_s24  ;;  %s1766_s24 = smul.u32 768, %s1985_s16  ;;  %s2747_s16 = scalar_lea.sflag [#allocation4], %s188_s17 }
 0x1bc   : > { %v876_v21 = vpop.permute.xlu1 %875  ;;  %v888_v56 = vpop.permute.xlu0 %887 }
 0x1bd   : > { %v880_v25 = vadd.f32 %v876_v21, %v838_v50  ;;  %v893_v10 = vadd.f32 %v888_v56, %v851_v52  ;;  %v1438_v52 = vmul.f32 %v1436_v36, %v2648_v49  ;;  %v1014_v21 = vstv %s2665_s25 }
 0x1be   : > { %1381 = vrot.lane.b32.xlu1 %v1376_v15, %s1940_s5  ;;  %1393 = vrot.lane.b32.xlu0 %v1389_v20, %s1940_s5 }
 0x1bf   : > { %v908_v29 = vadd.f32 %v906_v41, %v880_v25  ;;  %v913_v61 = vadd.f32 %v911_v28, %v893_v10  ;;  %v1493_v10 = vmul.f32 %v1492_v13, %v2636_v14  ;;  %v1506_v41 = vstv %s2669_s26 }
 0x1c0   : > { %v890_v31 = vpop.permute.xlu1 %889  ;;  %v922_v32 = vpop.permute.xlu0 %921  ;;  %v1507_v36 = vmul.f32 %v1506_v41, %v2636_v14 }
 0x1c1   : > { %v894_v35 = vadd.f32 %v890_v31, %v852_v57  ;;  %v927_v37 = vadd.f32 %v922_v32, %v901_v1  ;;  %v1478_v1 = vstv %s2651_s19  ;;  %v1015_v31 = vmul.f32 %v1014_v21, %v2374_v23  ;;  %s1765_s19 = smul.u32 48, %s188_s17 }
 0x1c2   : > { %1395 = vrot.lane.b32.xlu1 %v1390_v22, %s1940_s5  ;;  %1407 = vrot.lane.b32.xlu0 %v1403_v58, %s1940_s5  ;;  %v1479_v12 = vmul.f32 %v1478_v1, %v2636_v14  ;;  %v1480_v25 = vmul.f32 %v1478_v1, %v2648_v49 }
 0x1c3   : > { %v914_v39 = vadd.f32 %v912_v38, %v894_v35  ;;  %s190_s20 = scalar_lea.vmem [#allocation8], %s1765_s19 }
 0x1c4   : > { %v924_v40 = vpop.permute.xlu1 %923  ;;  %v936_v44 = vpop.permute.xlu0 %935  ;;  %s1548_s25 = sshll.u32 %s190_s20, 4  ;;  %s2737_s25 = int_to_ptr.vmem [resolvable:$true] %s1548_s25 }
 0x1c5   : > { %v928_v43 = vadd.f32 %v924_v40, %v902_v17  ;;  %v941_v47 = vadd.f32 %v936_v44, %v907_v11  ;;  %v1004_v17 = vmul.f32 %v1002_v55, %v2388_v30  ;;  %v1009_v11 = vmul.f32 %v1008_v3, %v2374_v23 }
 0x1c6   : > { %1409 = vrot.lane.b32.xlu1 %v1404_v45, %s1940_s5  ;;  %1441 = vrot.lane.b32.xlu0 %v1437_v4, %s1939_s28  ;;  %v1016_v40 = vmul.f32 %v1014_v21, %v2388_v30  ;;  %v1508_v4 = vmul.f32 %v1506_v41, %v2648_v49 }
 0x1c8   : > { %v938_v48 = vpop.permute.xlu1 %937  ;;  %v950_v50 = vpop.permute.xlu0 %949 }
 0x1c9   : > { %v942_v53 = vadd.f32 %v938_v48, %v908_v29  ;;  %v955_v19 = vadd.f32 %v950_v50, %v913_v61  ;;  %v1010_v61 = vmul.f32 %v1008_v3, %v2388_v30  ;;  %v1118_v3 = vstv %s1723_s29  ;;  %s1863_s29 = scalar_lea.vmem %s2737_s25, 768 }
 0x1ca   : > { %1443 = vrot.lane.b32.xlu1 %v1438_v52, %s1939_s28  ;;  %1455 = vrot.lane.b32.xlu0 %v1451_v51, %s1939_s28  ;;  %p1864_p10 = scmp.ne.s32.totalorder %s2737_s25, %s1863_s29 }
 0x1cc   : > { %v952_v60 = vpop.permute.xlu1 %951  ;;  %v964_v57 = vpop.permute.xlu0 %963  ;;  %p1865_p0 = pnand %p1864_p10, %p2804_p12 }
 0x1cd   : > { %v956_v63 = vadd.f32 %v952_v60, %v914_v39  ;;  %v969_v0 = vadd.f32 %v964_v57, %v927_v37  ;;  %v1494_v37 = vmul.f32 %v1492_v13, %v2648_v49  ;;  %v1112_v60 = vstv %s1722_s27  ;;  %s2742_s27 = scalar_lea.hbm %s2791_s3, %s1766_s24 }
 0x1ce   : > { %1457 = vrot.lane.b32.xlu1 %v1452_v59, %s1939_s28  ;;  %1469 = vrot.lane.b32.xlu0 %v1465_v62, %s1939_s28  ;;  %p1866_p7 = pneg %p1865_p0 }
 0x1cf   : > { %v1005_v5 = vadd.f32 %v1003_v2, %v969_v0  ;;  %v1113_v2 = vmul.f32 %v1112_v60, %v2447_v26 }
 0x1d0   : > { %v966_v6 = vpop.permute.xlu1 %965  ;;  %v978_v7 = vpop.permute.xlu0 %977 }
 0x1d1   : > { %v970_v9 = vadd.f32 %v966_v6, %v928_v43  ;;  %v983_v16 = vadd.f32 %v978_v7, %v941_v47 }
 0x1d2   : > { %1471 = vrot.lane.b32.xlu1 %v1466_v8, %s1939_s28  ;;  %1483 = vrot.lane.b32.xlu0 %v1479_v12, %s1940_s5  ;;  %s1721_s28 = sld [smem:[#allocation3 + $0x18]] }
 0x1d3   : > { %v1006_v56 = vadd.f32 %v1004_v17, %v970_v9  ;;  %v1011_v15 = vadd.f32 %v1009_v11, %v983_v16  ;;  %v1114_v9 = vmul.f32 %v1112_v60, %v2461_v33  ;;  %v1119_v16 = vmul.f32 %v1118_v3, %v2447_v26 }
 0x1d4   : > { %v980_v20 = vpop.permute.xlu1 %979  ;;  %v992_v24 = vpop.permute.xlu0 %991 }
 0x1d5   : > { %v984_v28 = vadd.f32 %v980_v20, %v942_v53  ;;  %v997_v29 = vadd.f32 %v992_v24, %v955_v19  ;;  %v1120_v24 = vmul.f32 %v1118_v3, %v2461_v33 }
 0x1d6   : > { %1485 = vrot.lane.b32.xlu1 %v1480_v25, %s1940_s5  ;;  %1497 = vrot.lane.b32.xlu0 %v1493_v10, %s1940_s5 }
 0x1d7   : > { %v1012_v32 = vadd.f32 %v1010_v61, %v984_v28  ;;  %v1017_v22 = vadd.f32 %v1015_v31, %v997_v29 }
 0x1d8   : > { %v994_v58 = vpop.permute.xlu1 %993  ;;  %v1026_v35 = vpop.permute.xlu0 %1025  ;;  %v1106_v30 = vstv %s1721_s28 }
 0x1d9   : > { %v998_v38 = vadd.f32 %v994_v58, %v956_v63  ;;  %v1031_v39 = vadd.f32 %v1026_v35, %v1005_v5  ;;  %v1107_v55 = vmul.f32 %v1106_v30, %v2447_v26  ;;  %v1108_v1 = vmul.f32 %v1106_v30, %v2461_v33 }
 0x1da   : > { %1499 = vrot.lane.b32.xlu1 %v1494_v37, %s1940_s5  ;;  %1511 = vrot.lane.b32.xlu0 %v1507_v36, %s1940_s5  ;;  %v1216_v33 = vstv %s1731_s30 }
 0x1db   : > { %v1018_v23 = vadd.f32 %v1016_v40, %v998_v38 }
 0x1dc   : > { %v1028_v44 = vpop.permute.xlu1 %1027  ;;  %v1040_v45 = vpop.permute.xlu0 %1039 }
 0x1dd   : > { %v1032_v43 = vadd.f32 %v1028_v44, %v1006_v56  ;;  %v1045_v47 = vadd.f32 %v1040_v45, %v1011_v15 }
 0x1de   : > { %1513 = vrot.lane.b32.xlu1 %v1508_v4, %s1940_s5  ;;  %s1730_s5 = sld [smem:[#allocation3 + $0x1b]] }
 0x1e0   : > { %v1042_v27 = vpop.permute.xlu1 %1041  ;;  %v1054_v48 = vpop.permute.xlu0 %1053 }
 0x1e1   : > { %v1046_v50 = vadd.f32 %v1042_v27, %v1012_v32  ;;  %v1059_v52 = vadd.f32 %v1054_v48, %v1017_v22 }
 0x1e4   : > { %v1056_v51 = vpop.permute.xlu1 %1055  ;;  %v1068_v53 = vpop.permute.xlu0 %1067  ;;  %v1210_v26 = vstv %s1730_s5  ;;  %s1941_s5 = smov [#allocation8]  }
 0x1e5   : > { %v1060_v19 = vadd.f32 %v1056_v51, %v1018_v23  ;;  %v1073_v54 = vadd.f32 %v1068_v53, %v1031_v39  ;;  %v1211_v38 = vmul.f32 %v1210_v26, %v2514_v34  ;;  %v1212_v4 = vmul.f32 %v1210_v26, %v2526_v42  ;;  %s1867_s30 = sshll.u32 %s1941_s5, 4  ;;  %s1868_s30 = int_to_ptr.vmem [resolvable:$false] %s1867_s30 }
 0x1e6   : > { %v1218_v53 = vmul.f32 %v1216_v33, %v2526_v42  ;;  %p1870_p8 = scmp.lt.s32.totalorder %s2737_s25, %s1868_s30 }
 0x1e7   : > { %v1109_v57 = vadd.f32 %v1107_v55, %v1073_v54 }
 0x1e8   : > { %v1070_v59 = vpop.permute.xlu1 %1069  ;;  %v1082_v62 = vpop.permute.xlu0 %1081 }
 0x1e9   : > { %v1074_v63 = vadd.f32 %v1070_v59, %v1032_v43  ;;  %v1087_v0 = vadd.f32 %v1082_v62, %v1045_v47  ;;  %v1217_v43 = vmul.f32 %v1216_v33, %v2514_v34  ;;  %v1222_v47 = vstv %s1732_s4  ;;  %s1869_s4 = scalar_lea.vmem %s1868_s30, 1536 }
 0x1ea   : > { %v1224_v62 = vmul.f32 %v1222_v47, %v2526_v42  ;;  %p1871_p11 = scmp.lt.s32.totalorder %s1869_s4, %s1863_s29 }
 0x1eb   : > { %v1110_v5 = vadd.f32 %v1108_v1, %v1074_v63  ;;  %v1115_v6 = vadd.f32 %v1113_v2, %v1087_v0 }
 0x1ec   : > { %v1084_v7 = vpop.permute.xlu1 %1083  ;;  %v1096_v8 = vpop.permute.xlu0 %1095  ;;  %p1872_p13 = por %p1871_p11, %p1870_p8 }
 0x1ed   : > { %v1088_v12 = vadd.f32 %v1084_v7, %v1046_v50  ;;  %v1101_v13 = vadd.f32 %v1096_v8, %v1059_v52 }
 0x1ee   : > { %p1873_p1 = pnand %p1872_p13, %p1866_p7 }
 0x1ef   : > { %v1116_v17 = vadd.f32 %v1114_v9, %v1088_v12  ;;  %v1121_v11 = vadd.f32 %v1119_v16, %v1101_v13  ;;  %v1320_v13 = vstv %s1740_s7 }
 0x1f0   : > { %v1098_v21 = vpop.permute.xlu1 %1097  ;;  %v1130_v56 = vpop.permute.xlu0 %1129 }
 0x1f1   : > { %v1102_v15 = vadd.f32 %v1098_v21, %v1060_v19  ;;  %v1135_v20 = vadd.f32 %v1130_v56, %v1109_v57  ;;  %v1223_v19 = vmul.f32 %v1222_v47, %v2514_v34 }
 0x1f3   : > { %v1122_v25 = vadd.f32 %v1120_v24, %v1102_v15  ;;  %v1326_v24 = vstv %s2710_s8 }
 0x1f4   : > { %v1132_v10 = vpop.permute.xlu1 %1131  ;;  %v1144_v41 = vpop.permute.xlu0 %1143  ;;  %v1327_v26 = vmul.f32 %v1326_v24, %v2575_v18 }
 0x1f5   : > { %v1136_v28 = vadd.f32 %v1132_v10, %v1110_v5  ;;  %v1149_v29 = vadd.f32 %v1144_v41, %v1115_v6  ;;  %v1314_v5 = vstv %s1739_s6 }
 0x1f6   : > { %v1315_v12 = vmul.f32 %v1314_v5, %v2575_v18  ;;  %v1316_v15 = vmul.f32 %v1314_v5, %v2587_v46 }
 0x1f8   : > { %v1146_v61 = vpop.permute.xlu1 %1145  ;;  %v1158_v31 = vpop.permute.xlu0 %1157 }
 0x1f9   : > { %v1150_v32 = vadd.f32 %v1146_v61, %v1116_v17  ;;  %v1163_v22 = vadd.f32 %v1158_v31, %v1121_v11 }
 0x1fc   : > { %v1160_v58 = vpop.permute.xlu1 %1159  ;;  %v1172_v35 = vpop.permute.xlu0 %1171 }
 0x1fd   : > { %v1164_v37 = vadd.f32 %v1160_v58, %v1122_v25  ;;  %v1177_v36 = vadd.f32 %v1172_v35, %v1135_v20  ;;  %v1321_v20 = vmul.f32 %v1320_v13, %v2575_v18 }
 0x1ff   : > { %v1213_v39 = vadd.f32 %v1211_v38, %v1177_v36 }
 0x200   : > { %v1174_v40 = vpop.permute.xlu1 %1173  ;;  %v1186_v23 = vpop.permute.xlu0 %1185 }
 0x201   : > { %v1178_v44 = vadd.f32 %v1174_v40, %v1136_v28  ;;  %v1191_v45 = vadd.f32 %v1186_v23, %v1149_v29 }
 0x203   : > { %v1214_v27 = vadd.f32 %v1212_v4, %v1178_v44  ;;  %v1219_v48 = vadd.f32 %v1217_v43, %v1191_v45  ;;  %v1418_v43 = vstv %s1748_s9 }
 0x204   : > { %v1188_v50 = vpop.permute.xlu1 %1187  ;;  %v1200_v52 = vpop.permute.xlu0 %1199 }
 0x205   : > { %v1192_v30 = vadd.f32 %v1188_v50, %v1150_v32  ;;  %v1205_v51 = vadd.f32 %v1200_v52, %v1163_v22  ;;  %v1322_v22 = vmul.f32 %v1320_v13, %v2587_v46  ;;  %v1419_v50 = vmul.f32 %v1418_v43, %v2636_v14 }
 0x206   : > { %v1424_v52 = vstv %s1749_s10 }
 0x207   : > { %v1220_v54 = vadd.f32 %v1218_v53, %v1192_v30  ;;  %v1225_v55 = vadd.f32 %v1223_v19, %v1205_v51 }
 0x208   : > { %v1202_v60 = vpop.permute.xlu1 %1201  ;;  %v1234_v57 = vpop.permute.xlu0 %1233 }
 0x209   : > { %v1206_v59 = vadd.f32 %v1202_v60, %v1164_v37  ;;  %v1239_v6 = vadd.f32 %v1234_v57, %v1213_v39  ;;  %v1328_v39 = vmul.f32 %v1326_v24, %v2587_v46  ;;  %v1420_v60 = vmul.f32 %v1418_v43, %v2648_v49 }
 0x20a   : > { %v1425_v57 = vmul.f32 %v1424_v52, %v2636_v14 }
 0x20b   : > { %v1226_v63 = vadd.f32 %v1224_v62, %v1206_v59  ;;  %v1430_v59 = vstv %s2719_s11 }
 0x20c   : > { %v1236_v0 = vpop.permute.xlu1 %1235  ;;  %v1248_v1 = vpop.permute.xlu0 %1247 }
 0x20d   : > { %v1240_v9 = vadd.f32 %v1236_v0, %v1214_v27  ;;  %v1253_v42 = vadd.f32 %v1248_v1, %v1219_v48 }
 0x210   : > { %v1250_v2 = vpop.permute.xlu1 %1249  ;;  %v1262_v3 = vpop.permute.xlu0 %1261 }
 0x211   : > { %v1254_v25 = vadd.f32 %v1250_v2, %v1220_v54  ;;  %v1267_v10 = vadd.f32 %v1262_v3, %v1225_v55 }
 0x214   : > { %v1264_v34 = vpop.permute.xlu1 %1263  ;;  %v1276_v7 = vpop.permute.xlu0 %1275 }
 0x215   : > { %v1281_v8 = vadd.f32 %v1276_v7, %v1239_v6  ;;  %v1268_v58 = vadd.f32 %v1264_v34, %v1226_v63  ;;  %v1426_v34 = vmul.f32 %v1424_v52, %v2648_v49  ;;  %v1431_v7 = vmul.f32 %v1430_v59, %v2636_v14 }
 0x217   : > { %v1317_v16 = vadd.f32 %v1315_v12, %v1281_v8 }
 0x218   : > { %v1278_v17 = vpop.permute.xlu1 %1277  ;;  %v1290_v11 = vpop.permute.xlu0 %1289 }
 0x219   : > { %v1282_v21 = vadd.f32 %v1278_v17, %v1240_v9  ;;  %v1295_v56 = vadd.f32 %v1290_v11, %v1253_v42  ;;  %v1432_v17 = vmul.f32 %v1430_v59, %v2648_v49 }
 0x21b   : > { %v1318_v41 = vadd.f32 %v1316_v15, %v1282_v21  ;;  %v1323_v28 = vadd.f32 %v1321_v20, %v1295_v56 }
 0x21c   : > { %v1292_v29 = vpop.permute.xlu1 %1291  ;;  %v1304_v61 = vpop.permute.xlu0 %1303 }
 0x21d   : > { %v1296_v31 = vadd.f32 %v1292_v29, %v1254_v25  ;;  %v1309_v32 = vadd.f32 %v1304_v61, %v1267_v10 }
 0x21f   : > { %v1324_v35 = vadd.f32 %v1322_v22, %v1296_v31  ;;  %v1329_v37 = vadd.f32 %v1327_v26, %v1309_v32 }
 0x220   : > { %v1306_v36 = vpop.permute.xlu1 %1305  ;;  %v1338_v38 = vpop.permute.xlu0 %1337 }
 0x221   : > { %v1310_v33 = vadd.f32 %v1306_v36, %v1268_v58  ;;  %v1343_v18 = vadd.f32 %v1338_v38, %v1317_v16 }
 0x223   : > { %v1330_v40 = vadd.f32 %v1328_v39, %v1310_v33 }
 0x224   : > { %v1340_v23 = vpop.permute.xlu1 %1339  ;;  %v1352_v44 = vpop.permute.xlu0 %1351 }
 0x225   : > { %v1344_v30 = vadd.f32 %v1340_v23, %v1318_v41  ;;  %v1357_v46 = vadd.f32 %v1352_v44, %v1323_v28 }
 0x228   : > { %v1354_v45 = vpop.permute.xlu1 %1353  ;;  %v1366_v4 = vpop.permute.xlu0 %1365 }
 0x229   : > { %v1358_v62 = vadd.f32 %v1354_v45, %v1324_v35  ;;  %v1371_v63 = vadd.f32 %v1366_v4, %v1329_v37 }
 0x22c   : > { %v1368_v47 = vpop.permute.xlu1 %1367  ;;  %v1380_v27 = vpop.permute.xlu0 %1379 }
 0x22d   : > { %v1385_v48 = vadd.f32 %v1380_v27, %v1343_v18  ;;  %v1372_v8 = vadd.f32 %v1368_v47, %v1330_v40 }
 0x22f   : > { %v1421_v51 = vadd.f32 %v1419_v50, %v1385_v48 }
 0x230   : > { %v1382_v53 = vpop.permute.xlu1 %1381  ;;  %v1394_v19 = vpop.permute.xlu0 %1393 }
 0x231   : > { %v1386_v54 = vadd.f32 %v1382_v53, %v1344_v30  ;;  %v1399_v55 = vadd.f32 %v1394_v19, %v1357_v46 }
 0x233   : > { %v1422_v0 = vadd.f32 %v1420_v60, %v1386_v54  ;;  %v1427_v1 = vadd.f32 %v1425_v57, %v1399_v55 }
 0x234   : > { %v1396_v2 = vpop.permute.xlu1 %1395  ;;  %v1408_v3 = vpop.permute.xlu0 %1407 }
 0x235   : > { %v1400_v5 = vadd.f32 %v1396_v2, %v1358_v62  ;;  %v1413_v6 = vadd.f32 %v1408_v3, %v1371_v63 }
 0x237   : > { %v1428_v12 = vadd.f32 %v1426_v34, %v1400_v5  ;;  %v1433_v13 = vadd.f32 %v1431_v7, %v1413_v6 }
 0x238   : > { %v1410_v9 = vpop.permute.xlu1 %1409  ;;  %v1442_v42 = vpop.permute.xlu0 %1441 }
 0x239   : > { %v1414_v16 = vadd.f32 %v1410_v9, %v1372_v8  ;;  %v1447_v24 = vadd.f32 %v1442_v42, %v1421_v51 }
 0x23b   : > { %v1434_v11 = vadd.f32 %v1432_v17, %v1414_v16 }
 0x23c   : > { %v1444_v21 = vpop.permute.xlu1 %1443  ;;  %v1456_v56 = vpop.permute.xlu0 %1455 }
 0x23d   : > { %v1448_v41 = vadd.f32 %v1444_v21, %v1422_v0  ;;  %v1461_v28 = vadd.f32 %v1456_v56, %v1427_v1 }
 0x240   : > { %v1458_v15 = vpop.permute.xlu1 %1457  ;;  %v1470_v20 = vpop.permute.xlu0 %1469 }
 0x241   : > { %v1462_v22 = vadd.f32 %v1458_v15, %v1428_v12  ;;  %v1475_v26 = vadd.f32 %v1470_v20, %v1433_v13 }
 0x244   : > { %v1472_v25 = vpop.permute.xlu1 %1471  ;;  %v1484_v10 = vpop.permute.xlu0 %1483 }
 0x245   : > { %v1489_v14 = vadd.f32 %v1484_v10, %v1447_v24  ;;  %v1476_v39 = vadd.f32 %v1472_v25, %v1434_v11 }
 0x247   : > { %v1519_v29 = vmax.f32 %v1489_v14, 0.0 }
 0x248   : > { %v1486_v61 = vpop.permute.xlu1 %1485  ;;  %v1498_v31 = vpop.permute.xlu0 %1497 }
 0x249   : > { %1522 = vst.msk [vmem:[%s190_s20] sm:$0xff] %vm1521_vm3, %v1519_v29  ;;  %v1490_v49 = vadd.f32 %v1486_v61, %v1448_v41  ;;  %v1503_v32 = vadd.f32 %v1498_v31, %v1461_v28 }
 0x24b   : > { %v1520_v58 = vmax.f32 %v1490_v49, 0.0  ;;  %v1524_v35 = vmax.f32 %v1503_v32, 0.0 }
 0x24c   : > { %v1500_v37 = vpop.permute.xlu1 %1499  ;;  %v1512_v36 = vpop.permute.xlu0 %1511 }
 0x24d   : > { %1523 = vst.msk [vmem:[%s190_s20 + $0x8] sm:$0xff] %vm1521_vm3, %v1520_v58  ;;  %1757 = vst.msk [vmem:[%s190_s20 + $0x10] sm:$0xff] %vm1521_vm3, %v1524_v35  ;;  %v1504_v38 = vadd.f32 %v1500_v37, %v1462_v22  ;;  %v1517_v33 = vadd.f32 %v1512_v36, %v1475_v26 }
 0x24f   : > { %v1525_v40 = vmax.f32 %v1504_v38, 0.0  ;;  %v1529_v23 = vmax.f32 %v1517_v33, 0.0 }
 0x250   : > { %v1514_v44 = vpop.permute.xlu1 %1513 }
 0x251   : > { %1758 = vst.msk [vmem:[%s190_s20 + $0x18] sm:$0xff] %vm1521_vm3, %v1525_v40  ;;  %1759 = vst.msk [vmem:[%s190_s20 + $0x20] sm:$0xff] %vm1521_vm3, %v1529_v23  ;;  %v1518_v45 = vadd.f32 %v1514_v44, %v1476_v39 }
 0x253   : > { %v1530_v4 = vmax.f32 %v1518_v45, 0.0 }
 0x255   : > { %1760 = vst.msk [vmem:[%s190_s20 + $0x28] sm:$0xff] %vm1521_vm3, %v1530_v4 }
 0x256   : > { %1876 = shalt.err (!%p1873_p1)
}
 0x257   : > { %s1877_s6 = scalar_lea.hbm %s2742_s27, 768  ;;  %s1881_s9 = scalar_lea.hbm %s2791_s3, 1536 }
 0x258   : > { %p1878_p2 = scmp.ne.s32.totalorder %s2742_s27, %s1877_s6  ;;  %p1882_p9 = scmp.lt.u32.totalorder %s2742_s27, %s2791_s3 }
 0x259   : > { %p1883_p5 = scmp.lt.u32.totalorder %s1881_s9, %s1877_s6  ;;  %p1885_p10 = scmp.lt.u32.totalorder %s1877_s6, %s2742_s27 }
 0x25a   : > { %p1879_p3 = pnand %p1878_p2, %p2804_p12 }
 0x25b   : > { %p1884_p6 = por %p1883_p5, %p1882_p9 }
 0x25c   : > { %p1880_p4 = pneg %p1879_p3 }
 0x25d   : > { %p1886_p0 = por %p1885_p10, %p1884_p6 }
 0x25f   : > { %p1887_p7 = pnand %p1886_p0, %p1880_p4 }
 0x261   : > { %1890 = shalt.err (!%p1887_p7)
}
 0x262   : > { %s1942_s17 = smov 128   ;;  %s1943_s19 = smov 8  }
 0x263   : > { %1775 = dma.vmem_to_hbm [thread:$0]  (%p2804_p12), %s2737_s25, 768, %s2742_s27, %s2747_s16, %s1942_s17, %s1942_s17, %s1943_s19  }
 0x264 PF: > { %p1792_p8 = scmp.ge.s32.totalorder %s1933_s15, 2  ;;  %s1563_s20 = sand.u32 1, %s1921_s12  }
 0x265   : > { %p2805_p11 = scmp.ne.s32.totalorder %s2796_s23, 0  ;;  %s1564_s24 = scalar_lea.sflag [#allocation4], %s1563_s20 }
 0x267   : > { %p1785_p13 = pnand %p1792_p8, %p2805_p11 }
 0x269   : > { %1916 = dma.done.wait (!%p1785_p13), %s1564_s24, 768  }
 0x26a   : > { %1918 = vsyncadd (!%p1785_p13), %s1564_s24, 4294966528  ;;  %p15_p1 = scmp.ge.s32.totalorder %s1989_s18, 4   ;;  %s2806_s12 = smov %s1925_s13 }
 0x26b   : > { %s2807_s13 = smov %s1929_s14  ;;  %s2808_s14 = smov %s2000_s21 }
 0x26c   : > { %s2809_s15 = smov %s1989_s18  ;;  %17 = sbr.rel (!%p15_p1) target bundleno = 5 (0x5), region = 84 }
 0x273   :  { %1569 = vsyncpa [#allocation4], 1 }
 0x274   :  { %1571 = vsyncpa [#allocation4 + $0x1], 1 }
 0x275   :  { %1572 = vsyncpa [#allocation5], 1 }
 0x276   :  { %1574 = vsyncpa [#allocation5 + $0x1], 1 }
 0x277   :  { %1575 = vsyncpa [#allocation7], 1 }

</bundles_post_ra>
